<compile_context>
chip_gen: v6e
topology: v6e:2x2x1
jax: 0.10.0
libtpu: 0.0.40
codegen_flags: <defaults>
</compile_context>

<pallas_src>
import jax
import jax.numpy as jnp
from jax.experimental import pallas as pl
from jax.experimental.pallas import tpu as pltpu

EPS = 1e-5
LANE = 128


def _round_up(x, m):
    return (x + m - 1) // m * m


def _bn_relu(y, g, b):
    """Training-mode BatchNorm1d over rows (B*L) per channel + ReLU, f32 math.

    Single traversal: the centered value is reused for the variance and the
    normalize (no second full pass over the activation slab).
    """
    m = jnp.mean(y, axis=0, keepdims=True)
    c = y - m
    v = jnp.mean(c * c, axis=0, keepdims=True)
    return jnp.maximum(c * jax.lax.rsqrt(v + EPS) * g + b, 0.0)


def upblock_kernel(x1_ref, x2p_ref, wup_ref, bup_ref,
                   w1_ref, g1_ref, be1_ref,
                   w2_ref, g2_ref, be2_ref,
                   o_ref, xcat_ref, yp_ref):
    B, L1, Cpad = x1_ref.shape          # x1: (B, L1, Cpad), channels-last
    L2 = x2p_ref.shape[1] - 2           # x2p: (B, L2+2, Cpad), halo-padded
    Coutpad = w1_ref.shape[2]
    left = (L2 - 2 * L1) // 2           # static F.pad left amount

    # --- ConvTranspose1d(C2 -> C2, kernel=2, stride=2): one 2-D MXU dot ---
    # wup columns [0:Cpad] = tap k=0, [Cpad:2Cpad] = tap k=1; the reshape
    # (B*L1, 2*Cpad) -> (B, 2*L1, Cpad) realizes the stride-2 interleave.
    # TODO(synk): per review, two per-tap dots + stride-2 sublane stores
    # (xcat_ref[:, pl.ds(1+left+t, L1, stride=2), Cpad:]) would avoid this
    # lane-halving reshape; kept the known-good reshape (modest at Cpad=128).
    x1f = x1_ref[...].reshape(B * L1, Cpad)
    up = jnp.dot(x1f, wup_ref[...], preferred_element_type=jnp.float32)
    up = up.reshape(B, 2 * L1, Cpad) + bup_ref[...]

    # --- assemble concat([x2, up], channels) + its k=3 halo in VMEM scratch ---
    # x2 half (lanes [0:Cpad]) is fully overwritten from x2p (already halo- and
    # channel-zero-padded in the wrapper).  For the up half (lanes [Cpad:]),
    # only the halo rows and the F.pad strips outside [r0, r1) need zeros.
    r0 = 1 + left
    r1 = r0 + 2 * L1
    xcat_ref[:, :, :Cpad] = x2p_ref[...].astype(xcat_ref.dtype)
    xcat_ref[:, 0:r0, Cpad:] = jnp.zeros((B, r0, Cpad), xcat_ref.dtype)
    xcat_ref[:, r1:L2 + 2, Cpad:] = jnp.zeros((B, L2 + 2 - r1, Cpad),
                                              xcat_ref.dtype)
    xcat_ref[:, r0:r1, Cpad:] = up.astype(xcat_ref.dtype)

    # --- Conv1d(2*C2 -> Cout, k=3, p=1): tap-sum MXU dots (no im2col slab) ---
    # Conv bias b1 omitted: it cancels exactly in training-mode BN.
    y = jnp.zeros((B * L2, Coutpad), jnp.float32)
    for k in range(3):
        xk = xcat_ref[:, k:k + L2, :].reshape(B * L2, 2 * Cpad)
        y = y + jnp.dot(xk, w1_ref[k], preferred_element_type=jnp.float32)
    y = _bn_relu(y, g1_ref[...], be1_ref[...])

    # --- Conv1d(Cout -> Cout, k=3, p=1): halo scratch + tap-sum dots ---
    yp_ref[:, 0:1, :] = jnp.zeros((B, 1, Coutpad), yp_ref.dtype)
    yp_ref[:, L2 + 1:L2 + 2, :] = jnp.zeros((B, 1, Coutpad), yp_ref.dtype)
    yp_ref[:, 1:L2 + 1, :] = y.reshape(B, L2, Coutpad).astype(yp_ref.dtype)
    y2 = jnp.zeros((B * L2, Coutpad), jnp.float32)
    for k in range(3):
        yk = yp_ref[:, k:k + L2, :].reshape(B * L2, Coutpad)
        y2 = y2 + jnp.dot(yk, w2_ref[k], preferred_element_type=jnp.float32)
    y2 = _bn_relu(y2, g2_ref[...], be2_ref[...])

    o_ref[...] = y2.reshape(B, L2, Coutpad).astype(o_ref.dtype)


def upblock_forward(x1_ncl, x2_ncl, params, *, mm_dtype=jnp.float32):
    """x1_ncl: (B, C/2, L1), x2_ncl: (B, C/2, L2) in PyTorch NCL layout.

    mm_dtype=f32 (default) is the exact, v5e-safe path; pass jnp.bfloat16 on
    v6e/v7x for half-width activations/weights/scratch and 2x MXU rate.
    """
    B, C2, L1 = x1_ncl.shape
    L2 = x2_ncl.shape[2]
    Cout = params['b1'].shape[0]
    assert L2 >= 2 * L1

    Cpad = _round_up(C2, LANE)
    Coutpad = _round_up(Cout, LANE)

    # NCL -> NLC, lane-dense channel padding, k=3 L-halo for x2; cast to
    # mm_dtype in the wrapper so the bf16 path halves input DMA bytes.
    x1 = jnp.transpose(x1_ncl.astype(jnp.float32), (0, 2, 1))
    x1 = jnp.pad(x1, ((0, 0), (0, 0), (0, Cpad - C2))).astype(mm_dtype)
    x2p = jnp.transpose(x2_ncl.astype(jnp.float32), (0, 2, 1))
    x2p = jnp.pad(x2p, ((0, 0), (1, 1), (0, Cpad - C2))).astype(mm_dtype)

    # ConvTranspose1d weight (Cin, Cout, 2) -> (Cpad, 2*Cpad): column halves = taps.
    wup = jnp.zeros((Cpad, 2 * Cpad), jnp.float32)
    wup = wup.at[:C2, 0:C2].set(params['wup'][:, :, 0])
    wup = wup.at[:C2, Cpad:Cpad + C2].set(params['wup'][:, :, 1])

    # Conv1 weight (Cout, 2*C2, 3) -> per-tap matrices (3, 2*Cpad, Coutpad);
    # per-tap input-channel layout: [x2 block (Cpad) | up block (Cpad)].
    w1 = jnp.transpose(params['w1'], (2, 1, 0))                # (3, 2*C2, Cout)
    w1p = jnp.zeros((3, 2 * Cpad, Coutpad), jnp.float32)
    w1p = w1p.at[:, 0:C2, :Cout].set(w1[:, 0:C2, :])
    w1p = w1p.at[:, Cpad:Cpad + C2, :Cout].set(w1[:, C2:2 * C2, :])

    # Conv2 weight (Cout, Cout, 3) -> (3, Coutpad, Coutpad).
    w2 = jnp.transpose(params['w2'], (2, 1, 0))                # (3, Cout, Cout)
    w2p = jnp.zeros((3, Coutpad, Coutpad), jnp.float32)
    w2p = w2p.at[:, :Cout, :Cout].set(w2)

    def vec(p, n):  # per-channel vector -> (1, n) lane row, zero-padded, f32
        return jnp.pad(p.astype(jnp.float32), (0, n - p.shape[0])).reshape(1, n)

    bup = vec(params['bup'], Cpad)
    g1, be1 = vec(params['g1'], Coutpad), vec(params['be1'], Coutpad)
    g2, be2 = vec(params['g2'], Coutpad), vec(params['be2'], Coutpad)
    # b1 / b2 intentionally not passed: they cancel in training-mode BN.

    # VMEM budget from the actual live set (single invocation, no grid ->
    # single-buffered residents) + in-kernel temporaries, 2x margin for Mosaic
    # internal scratch / layout copies, capped at 40 MiB for v7x's 64 MiB VMEM.
    mmb = jnp.dtype(mm_dtype).itemsize
    f32b = 4
    live_bytes = (
        (x1.size + x2p.size + wup.size + w1p.size + w2p.size) * mmb
        + (bup.size + g1.size + be1.size + g2.size + be2.size) * f32b
        + B * L2 * Coutpad * f32b                        # output
        + B * (L2 + 2) * (2 * Cpad + Coutpad) * mmb      # xcat + yp scratch
        + B * 2 * L1 * Cpad * f32b                       # up temporary
        + B * L2 * 2 * Cpad * f32b                       # one per-tap operand
        + 3 * B * L2 * Coutpad * f32b)                   # y/y2 acc + centered
    vmem_limit = int(min(max(2 * live_bytes, 4 << 20), 40 << 20))

    vmem = pl.BlockSpec(memory_space=pltpu.MemorySpace.VMEM)
    out = pl.pallas_call(
        upblock_kernel,
        out_shape=jax.ShapeDtypeStruct((B, L2, Coutpad), jnp.float32),
        in_specs=[vmem] * 10,
        out_specs=vmem,
        scratch_shapes=[pltpu.VMEM((B, L2 + 2, 2 * Cpad), mm_dtype),
                        pltpu.VMEM((B, L2 + 2, Coutpad), mm_dtype)],
        compiler_params=pltpu.CompilerParams(vmem_limit_bytes=vmem_limit),
    )(x1, x2p,
      wup.astype(mm_dtype), bup,
      w1p.astype(mm_dtype), g1, be1,
      w2p.astype(mm_dtype), g2, be2)

    # Slice off channel padding, NLC -> NCL to match PyTorch output layout.
    return jnp.transpose(out[:, :, :Cout], (0, 2, 1))


def ref_upblock(x1, x2, p):
    """Pure-JAX reference in PyTorch NCL layout (for validation)."""
    B, C2, L1 = x1.shape
    up = jnp.einsum('bil,iok->bolk', x1, p['wup']).reshape(B, C2, 2 * L1)
    up = up + p['bup'][None, :, None]
    diff = x2.shape[2] - up.shape[2]
    up = jnp.pad(up, ((0, 0), (0, 0), (diff // 2, diff - diff // 2)))
    x = jnp.concatenate([x2, up], axis=1)

    def conv1d(x, w, b):
        L = x.shape[2]
        xp = jnp.pad(x, ((0, 0), (0, 0), (1, 1)))
        y = sum(jnp.einsum('bil,oi->bol', xp[:, :, k:k + L], w[:, :, k])
                for k in range(3))
        return y + b[None, :, None]

    def bn_relu(x, g, b):
        m = x.mean(axis=(0, 2), keepdims=True)
        v = ((x - m) ** 2).mean(axis=(0, 2), keepdims=True)
        return jnp.maximum((x - m) / jnp.sqrt(v + EPS) * g[None, :, None]
                           + b[None, :, None], 0.0)

    x = bn_relu(conv1d(x, p['w1'], p['b1']), p['g1'], p['be1'])
    x = bn_relu(conv1d(x, p['w2'], p['b2']), p['g2'], p['be2'])
    return x


if __name__ == "__main__":
    # UpBlock(in_channels=8, out_channels=4, kernel_size=3, use_2d=False, linear=False)
    in_channels, out_channels = 8, 4
    C2 = in_channels // 2
    B, L1, L2 = 2, 8, 16

    key = jax.random.PRNGKey(0)
    ks = jax.random.split(key, 12)
    params = {
        # ConvTranspose1d(C2, C2, 2, stride=2): weight (Cin, Cout, K), bias (Cout,)
        'wup': 0.2 * jax.random.normal(ks[0], (C2, C2, 2), jnp.float32),
        'bup': 0.1 * jax.random.normal(ks[1], (C2,), jnp.float32),
        # Conv1d(in_channels, out_channels, 3): weight (Cout, Cin, 3)
        'w1': 0.2 * jax.random.normal(ks[2], (out_channels, in_channels, 3), jnp.float32),
        'b1': 0.1 * jax.random.normal(ks[3], (out_channels,), jnp.float32),
        'g1': 1.0 + 0.1 * jax.random.normal(ks[4], (out_channels,), jnp.float32),
        'be1': 0.1 * jax.random.normal(ks[5], (out_channels,), jnp.float32),
        # Conv1d(out_channels, out_channels, 3)
        'w2': 0.2 * jax.random.normal(ks[6], (out_channels, out_channels, 3), jnp.float32),
        'b2': 0.1 * jax.random.normal(ks[7], (out_channels,), jnp.float32),
        'g2': 1.0 + 0.1 * jax.random.normal(ks[8], (out_channels,), jnp.float32),
        'be2': 0.1 * jax.random.normal(ks[9], (out_channels,), jnp.float32),
    }
    x1 = jax.random.normal(ks[10], (B, C2, L1), jnp.float32)   # (2, 4, 8)
    x2 = jax.random.normal(ks[11], (B, C2, L2), jnp.float32)   # (2, 4, 16)

    ref = ref_upblock(x1, x2, params)

    # f32 MXU operands (exact-semantics path, default on v5e).
    out = jax.block_until_ready(upblock_forward(x1, x2, params))
    assert out.shape == (B, out_channels, L2), out.shape
    assert jnp.allclose(out, ref, atol=1e-4, rtol=1e-4), \
        float(jnp.max(jnp.abs(out - ref)))

    # bf16 activations/weights/scratch (v6e/v7x fast path); acc + BN stay f32.
    out_bf16 = jax.block_until_ready(
        upblock_forward(x1, x2, params, mm_dtype=jnp.bfloat16))
    assert out_bf16.shape == (B, out_channels, L2), out_bf16.shape
    assert bool(jnp.all(jnp.isfinite(out_bf16)))
    assert jnp.allclose(out_bf16, ref, atol=1e-1, rtol=1e-1), \
        float(jnp.max(jnp.abs(out_bf16 - ref)))

    print("KERNEL_OK")
</pallas_src>

<mosaic_0001>
module attributes {stable_mosaic.version = 11 : i64} {
  func.func @upblock_kernel(%arg0: memref<2x8x128xf32, #tpu.memory_space<vmem>>, %arg1: memref<2x18x128xf32, #tpu.memory_space<vmem>>, %arg2: memref<128x256xf32, #tpu.memory_space<vmem>>, %arg3: memref<1x128xf32, #tpu.memory_space<vmem>>, %arg4: memref<3x256x128xf32, #tpu.memory_space<vmem>>, %arg5: memref<1x128xf32, #tpu.memory_space<vmem>>, %arg6: memref<1x128xf32, #tpu.memory_space<vmem>>, %arg7: memref<3x128x128xf32, #tpu.memory_space<vmem>>, %arg8: memref<1x128xf32, #tpu.memory_space<vmem>>, %arg9: memref<1x128xf32, #tpu.memory_space<vmem>>, %arg10: memref<2x16x128xf32, #tpu.memory_space<vmem>>, %arg11: memref<2x18x256xf32, #tpu.memory_space<vmem>>, %arg12: memref<2x18x128xf32, #tpu.memory_space<vmem>>) attributes {dimension_semantics = [], scalar_prefetch = 0 : i64, scratch_operands = 2 : i64, tpu.core_type = #tpu.core_type<tc>} {
    %c0 = arith.constant 0 : index
    %c0_0 = arith.constant 0 : index
    %c0_1 = arith.constant 0 : index
    %0 = vector.load %arg0[%c0, %c0_0, %c0_1] : memref<2x8x128xf32, #tpu.memory_space<vmem>>, vector<2x8x128xf32>
    %1 = vector.shape_cast %0 : vector<2x8x128xf32> to vector<16x128xf32>
    %c0_2 = arith.constant 0 : index
    %c0_3 = arith.constant 0 : index
    %2 = vector.load %arg2[%c0_2, %c0_3] : memref<128x256xf32, #tpu.memory_space<vmem>>, vector<128x256xf32>
    %cst = arith.constant dense<0.000000e+00> : vector<16x256xf32>
    %3 = tpu.matmul %1, %2, %cst {dimension_numbers = #tpu.dot_dimension_numbers<[1], [0], [0], [1], [0, 0, 1, 1], [], []>} : vector<16x128xf32>, vector<128x256xf32>, vector<16x256xf32> -> vector<16x256xf32>
    %4 = vector.shape_cast %3 : vector<16x256xf32> to vector<2x16x128xf32>
    %c0_4 = arith.constant 0 : index
    %c0_5 = arith.constant 0 : index
    %5 = vector.load %arg3[%c0_4, %c0_5] : memref<1x128xf32, #tpu.memory_space<vmem>>, vector<1x128xf32>
    %6 = vector.shape_cast %5 : vector<1x128xf32> to vector<1x1x128xf32>
    %7 = vector.broadcast %6 : vector<1x1x128xf32> to vector<2x16x128xf32>
    %8 = arith.addf %4, %7 : vector<2x16x128xf32>
    %c0_6 = arith.constant 0 : index
    %c0_7 = arith.constant 0 : index
    %c0_8 = arith.constant 0 : index
    %9 = vector.load %arg1[%c0_6, %c0_7, %c0_8] : memref<2x18x128xf32, #tpu.memory_space<vmem>>, vector<2x18x128xf32>
    %c0_9 = arith.constant 0 : index
    %c0_10 = arith.constant 0 : index
    %c0_11 = arith.constant 0 : index
    %10 = vector.load %arg11[%c0_9, %c0_10, %c0_11] : memref<2x18x256xf32, #tpu.memory_space<vmem>>, vector<2x18x128xf32>
    tpu.vector_store %arg11[%c0_9, %c0_10, %c0_11], %9 {strides = array<i32>} : memref<2x18x256xf32, #tpu.memory_space<vmem>>, vector<2x18x128xf32>,
    %cst_12 = arith.constant 0.000000e+00 : f32
    %11 = vector.broadcast %cst_12 : f32 to vector<2x1x128xf32>
    %c0_13 = arith.constant 0 : index
    %c0_14 = arith.constant 0 : index
    %c128 = arith.constant 128 : index
    %12 = vector.load %arg11[%c0_13, %c0_14, %c128] : memref<2x18x256xf32, #tpu.memory_space<vmem>>, vector<2x1x128xf32>
    tpu.vector_store %arg11[%c0_13, %c0_14, %c128], %11 {strides = array<i32>} : memref<2x18x256xf32, #tpu.memory_space<vmem>>, vector<2x1x128xf32>,
    %cst_15 = arith.constant 0.000000e+00 : f32
    %13 = vector.broadcast %cst_15 : f32 to vector<2x1x128xf32>
    %c0_16 = arith.constant 0 : index
    %c17 = arith.constant 17 : index
    %c128_17 = arith.constant 128 : index
    %14 = vector.load %arg11[%c0_16, %c17, %c128_17] : memref<2x18x256xf32, #tpu.memory_space<vmem>>, vector<2x1x128xf32>
    tpu.vector_store %arg11[%c0_16, %c17, %c128_17], %13 {strides = array<i32>} : memref<2x18x256xf32, #tpu.memory_space<vmem>>, vector<2x1x128xf32>,
    %c0_18 = arith.constant 0 : index
    %c1 = arith.constant 1 : index
    %c128_19 = arith.constant 128 : index
    %15 = vector.load %arg11[%c0_18, %c1, %c128_19] : memref<2x18x256xf32, #tpu.memory_space<vmem>>, vector<2x16x128xf32>
    tpu.vector_store %arg11[%c0_18, %c1, %c128_19], %8 {strides = array<i32>} : memref<2x18x256xf32, #tpu.memory_space<vmem>>, vector<2x16x128xf32>,
    %cst_20 = arith.constant 0.000000e+00 : f32
    %16 = vector.broadcast %cst_20 : f32 to vector<32x128xf32>
    %c0_21 = arith.constant 0 : index
    %c0_22 = arith.constant 0 : index
    %c0_23 = arith.constant 0 : index
    %17 = vector.load %arg11[%c0_21, %c0_22, %c0_23] : memref<2x18x256xf32, #tpu.memory_space<vmem>>, vector<2x16x256xf32>
    %18 = vector.shape_cast %17 : vector<2x16x256xf32> to vector<32x256xf32>
    %c0_24 = arith.constant 0 : index
    %c0_25 = arith.constant 0 : index
    %c0_26 = arith.constant 0 : index
    %19 = vector.load %arg4[%c0_24, %c0_25, %c0_26] : memref<3x256x128xf32, #tpu.memory_space<vmem>>, vector<1x256x128xf32>
    %20 = vector.shape_cast %19 : vector<1x256x128xf32> to vector<256x128xf32>
    %cst_27 = arith.constant dense<0.000000e+00> : vector<32x128xf32>
    %21 = tpu.matmul %18, %20, %cst_27 {dimension_numbers = #tpu.dot_dimension_numbers<[1], [0], [0], [1], [0, 0, 1, 1], [], []>} : vector<32x256xf32>, vector<256x128xf32>, vector<32x128xf32> -> vector<32x128xf32>
    %22 = arith.addf %16, %21 : vector<32x128xf32>
    %c0_28 = arith.constant 0 : index
    %c1_29 = arith.constant 1 : index
    %c0_30 = arith.constant 0 : index
    %23 = vector.load %arg11[%c0_28, %c1_29, %c0_30] : memref<2x18x256xf32, #tpu.memory_space<vmem>>, vector<2x16x256xf32>
    %24 = vector.shape_cast %23 : vector<2x16x256xf32> to vector<32x256xf32>
    %c1_31 = arith.constant 1 : index
    %c0_32 = arith.constant 0 : index
    %c0_33 = arith.constant 0 : index
    %25 = vector.load %arg4[%c1_31, %c0_32, %c0_33] : memref<3x256x128xf32, #tpu.memory_space<vmem>>, vector<1x256x128xf32>
    %26 = vector.shape_cast %25 : vector<1x256x128xf32> to vector<256x128xf32>
    %cst_34 = arith.constant dense<0.000000e+00> : vector<32x128xf32>
    %27 = tpu.matmul %24, %26, %cst_34 {dimension_numbers = #tpu.dot_dimension_numbers<[1], [0], [0], [1], [0, 0, 1, 1], [], []>} : vector<32x256xf32>, vector<256x128xf32>, vector<32x128xf32> -> vector<32x128xf32>
    %28 = arith.addf %22, %27 : vector<32x128xf32>
    %c0_35 = arith.constant 0 : index
    %c2 = arith.constant 2 : index
    %c0_36 = arith.constant 0 : index
    %29 = vector.load %arg11[%c0_35, %c2, %c0_36] : memref<2x18x256xf32, #tpu.memory_space<vmem>>, vector<2x16x256xf32>
    %30 = vector.shape_cast %29 : vector<2x16x256xf32> to vector<32x256xf32>
    %c2_37 = arith.constant 2 : index
    %c0_38 = arith.constant 0 : index
    %c0_39 = arith.constant 0 : index
    %31 = vector.load %arg4[%c2_37, %c0_38, %c0_39] : memref<3x256x128xf32, #tpu.memory_space<vmem>>, vector<1x256x128xf32>
    %32 = vector.shape_cast %31 : vector<1x256x128xf32> to vector<256x128xf32>
    %cst_40 = arith.constant dense<0.000000e+00> : vector<32x128xf32>
    %33 = tpu.matmul %30, %32, %cst_40 {dimension_numbers = #tpu.dot_dimension_numbers<[1], [0], [0], [1], [0, 0, 1, 1], [], []>} : vector<32x256xf32>, vector<256x128xf32>, vector<32x128xf32> -> vector<32x128xf32>
    %34 = arith.addf %28, %33 : vector<32x128xf32>
    %c0_41 = arith.constant 0 : index
    %c0_42 = arith.constant 0 : index
    %35 = vector.load %arg5[%c0_41, %c0_42] : memref<1x128xf32, #tpu.memory_space<vmem>>, vector<1x128xf32>
    %c0_43 = arith.constant 0 : index
    %c0_44 = arith.constant 0 : index
    %36 = vector.load %arg6[%c0_43, %c0_44] : memref<1x128xf32, #tpu.memory_space<vmem>>, vector<1x128xf32>
    %cst_45 = arith.constant dense<0.000000e+00> : vector<128xf32>
    %37 = vector.multi_reduction <add>, %34, %cst_45 [0] : vector<32x128xf32> to vector<128xf32>
    %38 = vector.shape_cast %37 : vector<128xf32> to vector<1x128xf32>
    %cst_46 = arith.constant 3.200000e+01 : f32
    %39 = vector.broadcast %cst_46 : f32 to vector<1x128xf32>
    %40 = arith.divf %38, %39 : vector<1x128xf32>
    %41 = vector.broadcast %40 : vector<1x128xf32> to vector<32x128xf32>
    %42 = arith.subf %34, %41 : vector<32x128xf32>
    %43 = arith.mulf %42, %42 : vector<32x128xf32>
    %cst_47 = arith.constant dense<0.000000e+00> : vector<128xf32>
    %44 = vector.multi_reduction <add>, %43, %cst_47 [0] : vector<32x128xf32> to vector<128xf32>
    %45 = vector.shape_cast %44 : vector<128xf32> to vector<1x128xf32>
    %cst_48 = arith.constant 3.200000e+01 : f32
    %46 = vector.broadcast %cst_48 : f32 to vector<1x128xf32>
    %47 = arith.divf %45, %46 : vector<1x128xf32>
    %cst_49 = arith.constant 9.99999974E-6 : f32
    %48 = vector.broadcast %cst_49 : f32 to vector<1x128xf32>
    %49 = arith.addf %47, %48 : vector<1x128xf32>
    %50 = math.rsqrt %49 : vector<1x128xf32>
    %51 = vector.broadcast %50 : vector<1x128xf32> to vector<32x128xf32>
    %52 = arith.mulf %42, %51 : vector<32x128xf32>
    %53 = vector.broadcast %35 : vector<1x128xf32> to vector<32x128xf32>
    %54 = arith.mulf %52, %53 : vector<32x128xf32>
    %55 = vector.broadcast %36 : vector<1x128xf32> to vector<32x128xf32>
    %56 = arith.addf %54, %55 : vector<32x128xf32>
    %cst_50 = arith.constant 0.000000e+00 : f32
    %57 = vector.broadcast %cst_50 : f32 to vector<32x128xf32>
    %58 = arith.maximumf %56, %57 : vector<32x128xf32>
    %cst_51 = arith.constant 0.000000e+00 : f32
    %59 = vector.broadcast %cst_51 : f32 to vector<2x1x128xf32>
    %c0_52 = arith.constant 0 : index
    %c0_53 = arith.constant 0 : index
    %c0_54 = arith.constant 0 : index
    %60 = vector.load %arg12[%c0_52, %c0_53, %c0_54] : memref<2x18x128xf32, #tpu.memory_space<vmem>>, vector<2x1x128xf32>
    tpu.vector_store %arg12[%c0_52, %c0_53, %c0_54], %59 {strides = array<i32>} : memref<2x18x128xf32, #tpu.memory_space<vmem>>, vector<2x1x128xf32>,
    %cst_55 = arith.constant 0.000000e+00 : f32
    %61 = vector.broadcast %cst_55 : f32 to vector<2x1x128xf32>
    %c0_56 = arith.constant 0 : index
    %c17_57 = arith.constant 17 : index
    %c0_58 = arith.constant 0 : index
    %62 = vector.load %arg12[%c0_56, %c17_57, %c0_58] : memref<2x18x128xf32, #tpu.memory_space<vmem>>, vector<2x1x128xf32>
    tpu.vector_store %arg12[%c0_56, %c17_57, %c0_58], %61 {strides = array<i32>} : memref<2x18x128xf32, #tpu.memory_space<vmem>>, vector<2x1x128xf32>,
    %63 = vector.shape_cast %58 : vector<32x128xf32> to vector<2x16x128xf32>
    %c0_59 = arith.constant 0 : index
    %c1_60 = arith.constant 1 : index
    %c0_61 = arith.constant 0 : index
    %64 = vector.load %arg12[%c0_59, %c1_60, %c0_61] : memref<2x18x128xf32, #tpu.memory_space<vmem>>, vector<2x16x128xf32>
    tpu.vector_store %arg12[%c0_59, %c1_60, %c0_61], %63 {strides = array<i32>} : memref<2x18x128xf32, #tpu.memory_space<vmem>>, vector<2x16x128xf32>,
    %cst_62 = arith.constant 0.000000e+00 : f32
    %65 = vector.broadcast %cst_62 : f32 to vector<32x128xf32>
    %c0_63 = arith.constant 0 : index
    %c0_64 = arith.constant 0 : index
    %c0_65 = arith.constant 0 : index
    %66 = vector.load %arg12[%c0_63, %c0_64, %c0_65] : memref<2x18x128xf32, #tpu.memory_space<vmem>>, vector<2x16x128xf32>
    %67 = vector.shape_cast %66 : vector<2x16x128xf32> to vector<32x128xf32>
    %c0_66 = arith.constant 0 : index
    %c0_67 = arith.constant 0 : index
    %c0_68 = arith.constant 0 : index
    %68 = vector.load %arg7[%c0_66, %c0_67, %c0_68] : memref<3x128x128xf32, #tpu.memory_space<vmem>>, vector<1x128x128xf32>
    %69 = vector.shape_cast %68 : vector<1x128x128xf32> to vector<128x128xf32>
    %cst_69 = arith.constant dense<0.000000e+00> : vector<32x128xf32>
    %70 = tpu.matmul %67, %69, %cst_69 {dimension_numbers = #tpu.dot_dimension_numbers<[1], [0], [0], [1], [0, 0, 1, 1], [], []>} : vector<32x128xf32>, vector<128x128xf32>, vector<32x128xf32> -> vector<32x128xf32>
    %71 = arith.addf %65, %70 : vector<32x128xf32>
    %c0_70 = arith.constant 0 : index
    %c1_71 = arith.constant 1 : index
    %c0_72 = arith.constant 0 : index
    %72 = vector.load %arg12[%c0_70, %c1_71, %c0_72] : memref<2x18x128xf32, #tpu.memory_space<vmem>>, vector<2x16x128xf32>
    %73 = vector.shape_cast %72 : vector<2x16x128xf32> to vector<32x128xf32>
    %c1_73 = arith.constant 1 : index
    %c0_74 = arith.constant 0 : index
    %c0_75 = arith.constant 0 : index
    %74 = vector.load %arg7[%c1_73, %c0_74, %c0_75] : memref<3x128x128xf32, #tpu.memory_space<vmem>>, vector<1x128x128xf32>
    %75 = vector.shape_cast %74 : vector<1x128x128xf32> to vector<128x128xf32>
    %cst_76 = arith.constant dense<0.000000e+00> : vector<32x128xf32>
    %76 = tpu.matmul %73, %75, %cst_76 {dimension_numbers = #tpu.dot_dimension_numbers<[1], [0], [0], [1], [0, 0, 1, 1], [], []>} : vector<32x128xf32>, vector<128x128xf32>, vector<32x128xf32> -> vector<32x128xf32>
    %77 = arith.addf %71, %76 : vector<32x128xf32>
    %c0_77 = arith.constant 0 : index
    %c2_78 = arith.constant 2 : index
    %c0_79 = arith.constant 0 : index
    %78 = vector.load %arg12[%c0_77, %c2_78, %c0_79] : memref<2x18x128xf32, #tpu.memory_space<vmem>>, vector<2x16x128xf32>
    %79 = vector.shape_cast %78 : vector<2x16x128xf32> to vector<32x128xf32>
    %c2_80 = arith.constant 2 : index
    %c0_81 = arith.constant 0 : index
    %c0_82 = arith.constant 0 : index
    %80 = vector.load %arg7[%c2_80, %c0_81, %c0_82] : memref<3x128x128xf32, #tpu.memory_space<vmem>>, vector<1x128x128xf32>
    %81 = vector.shape_cast %80 : vector<1x128x128xf32> to vector<128x128xf32>
    %cst_83 = arith.constant dense<0.000000e+00> : vector<32x128xf32>
    %82 = tpu.matmul %79, %81, %cst_83 {dimension_numbers = #tpu.dot_dimension_numbers<[1], [0], [0], [1], [0, 0, 1, 1], [], []>} : vector<32x128xf32>, vector<128x128xf32>, vector<32x128xf32> -> vector<32x128xf32>
    %83 = arith.addf %77, %82 : vector<32x128xf32>
    %c0_84 = arith.constant 0 : index
    %c0_85 = arith.constant 0 : index
    %84 = vector.load %arg8[%c0_84, %c0_85] : memref<1x128xf32, #tpu.memory_space<vmem>>, vector<1x128xf32>
    %c0_86 = arith.constant 0 : index
    %c0_87 = arith.constant 0 : index
    %85 = vector.load %arg9[%c0_86, %c0_87] : memref<1x128xf32, #tpu.memory_space<vmem>>, vector<1x128xf32>
    %cst_88 = arith.constant dense<0.000000e+00> : vector<128xf32>
    %86 = vector.multi_reduction <add>, %83, %cst_88 [0] : vector<32x128xf32> to vector<128xf32>
    %87 = vector.shape_cast %86 : vector<128xf32> to vector<1x128xf32>
    %cst_89 = arith.constant 3.200000e+01 : f32
    %88 = vector.broadcast %cst_89 : f32 to vector<1x128xf32>
    %89 = arith.divf %87, %88 : vector<1x128xf32>
    %90 = vector.broadcast %89 : vector<1x128xf32> to vector<32x128xf32>
    %91 = arith.subf %83, %90 : vector<32x128xf32>
    %92 = arith.mulf %91, %91 : vector<32x128xf32>
    %cst_90 = arith.constant dense<0.000000e+00> : vector<128xf32>
    %93 = vector.multi_reduction <add>, %92, %cst_90 [0] : vector<32x128xf32> to vector<128xf32>
    %94 = vector.shape_cast %93 : vector<128xf32> to vector<1x128xf32>
    %cst_91 = arith.constant 3.200000e+01 : f32
    %95 = vector.broadcast %cst_91 : f32 to vector<1x128xf32>
    %96 = arith.divf %94, %95 : vector<1x128xf32>
    %cst_92 = arith.constant 9.99999974E-6 : f32
    %97 = vector.broadcast %cst_92 : f32 to vector<1x128xf32>
    %98 = arith.addf %96, %97 : vector<1x128xf32>
    %99 = math.rsqrt %98 : vector<1x128xf32>
    %100 = vector.broadcast %99 : vector<1x128xf32> to vector<32x128xf32>
    %101 = arith.mulf %91, %100 : vector<32x128xf32>
    %102 = vector.broadcast %84 : vector<1x128xf32> to vector<32x128xf32>
    %103 = arith.mulf %101, %102 : vector<32x128xf32>
    %104 = vector.broadcast %85 : vector<1x128xf32> to vector<32x128xf32>
    %105 = arith.addf %103, %104 : vector<32x128xf32>
    %cst_93 = arith.constant 0.000000e+00 : f32
    %106 = vector.broadcast %cst_93 : f32 to vector<32x128xf32>
    %107 = arith.maximumf %105, %106 : vector<32x128xf32>
    %108 = vector.shape_cast %107 : vector<32x128xf32> to vector<2x16x128xf32>
    %c0_94 = arith.constant 0 : index
    %c0_95 = arith.constant 0 : index
    %c0_96 = arith.constant 0 : index
    %109 = vector.load %arg10[%c0_94, %c0_95, %c0_96] : memref<2x16x128xf32, #tpu.memory_space<vmem>>, vector<2x16x128xf32>
    tpu.vector_store %arg10[%c0_94, %c0_95, %c0_96], %108 {strides = array<i32>} : memref<2x16x128xf32, #tpu.memory_space<vmem>>, vector<2x16x128xf32>,
    return
  }
}

</mosaic_0001>

<bundles_post_ra>
// kernel: tpu_custom_call.1
= control target key start
LH: loop header
LB: loop body
LE: loop exit
PB: predicated region body
PF: predicated region fallthrough
CT: control target
= control target key end

     0   :  { %15 = vsyncpa [#allocation5], 0  ;;  %s1837_s0 = inlined_call_operand.vmem [shape: f32[2,8,128], index: 0, kind: input, shape index: {}]   ;;  %s1838_s1 = inlined_call_operand.vmem [shape: f32[2,18,128], index: 1, kind: input, shape index: {}]   ;;  %s1839_s2 = inlined_call_operand.hbm [shape: f32[128,256], index: 2, kind: input, shape index: {}]   ;;  %s1840_s3 = inlined_call_operand.vmem [shape: f32[1,128], index: 3, kind: input, shape index: {}]   ;;  %s1841_s4 = inlined_call_operand.hbm [shape: f32[3,256,128], index: 4, kind: input, shape index: {}]   ;;  %s1842_s5 = inlined_call_operand.vmem [shape: f32[1,128], index: 5, kind: input, shape index: {}]   ;;  %s1843_s6 = inlined_call_operand.vmem [shape: f32[1,128], index: 6, kind: input, shape index: {}]   ;;  %s1844_s7 = inlined_call_operand.hbm [shape: f32[3,128,128], index: 7, kind: input, shape index: {}]   ;;  %s1845_s8 = inlined_call_operand.vmem [shape: f32[1,128], index: 8, kind: input, shape index: {}]   ;;  %s1846_s9 = inlined_call_operand.vmem [shape: f32[1,128], index: 9, kind: input, shape index: {}]   ;;  %s1847_s10 = inlined_call_operand.hbm [shape: f32[2,16,128], index: 10, kind: output, shape index: {}]  }
   0x1   :  { %16 = vsyncpa [#allocation8], 0 }
   0x2   :  { %17 = vsyncpa [#allocation6], 0  ;;  %s1652_s13 = smov [#allocation7]  }
   0x3   :  { %s41_s14 = sshll.u32 %s1652_s13, 4  ;;  %s42_s14 = int_to_ptr.vmem [resolvable:$true] %s41_s14 }
   0x4   :  { %s1574_s15 = scalar_lea.vmem %s42_s14, 12288  ;;  %p1579_p1 = scmp.lt.s32.totalorder %s42_s14, %s42_s14 }
   0x5   :  { %p1575_p0 = scmp.ne.s32.totalorder %s42_s14, %s1574_s15  ;;  %p1580_p2 = scmp.lt.s32.totalorder %s1574_s15, %s1574_s15 }
   0x7   :  { %p1581_p3 = por %p1580_p2, %p1579_p1 }
   0x9   :  { %p1582_p4 = pnand %p1581_p3, %p1575_p0 }
   0xb   :  { %1585 = shalt.err (!%p1582_p4)
}
   0xc   :  { %s1653_s16 = smov 128   ;;  %s1654_s17 = smov 8  }
   0xd   :  { %47 = dma.hbm_to_vmem [thread:$0]  %s1841_s4, 12288, %s42_s14, [#allocation8], %s1653_s16, %s1653_s16, %s1654_s17  }
   0xe   :  { %s1655_s20 = smov [#allocation4]  }
   0xf   :  { %s27_s21 = sshll.u32 %s1655_s20, 4  ;;  %s28_s21 = int_to_ptr.vmem [resolvable:$true] %s27_s21 }
  0x10   :  { %s1594_s22 = scalar_lea.vmem %s28_s21, 4096  ;;  %p1599_p6 = scmp.lt.s32.totalorder %s28_s21, %s28_s21 }
  0x11   :  { %p1595_p5 = scmp.ne.s32.totalorder %s28_s21, %s1594_s22  ;;  %p1600_p7 = scmp.lt.s32.totalorder %s1594_s22, %s1594_s22 }
  0x13   :  { %p1601_p8 = por %p1600_p7, %p1599_p6 }
  0x15   :  { %p1602_p9 = pnand %p1601_p8, %p1595_p5 }
  0x17   :  { %1605 = shalt.err (!%p1602_p9)
}
  0x18   :  { %s1656_s23 = smov 256   ;;  %s1657_s24 = smov 16  }
  0x19   :  { %33 = dma.hbm_to_vmem [thread:$0]  %s1839_s2, 4096, %s28_s21, [#allocation5], %s1656_s23, %s1656_s23, %s1657_s24  }
  0x1a   :  { %s1658_s27 = smov [#allocation9]  }
  0x1b   :  { %s57_s28 = sshll.u32 %s1658_s27, 4  ;;  %s58_s28 = int_to_ptr.vmem [resolvable:$true] %s57_s28 }
  0x1c   :  { %s1614_s4 = scalar_lea.vmem %s58_s28, 6144  ;;  %p1619_p11 = scmp.lt.s32.totalorder %s58_s28, %s58_s28 }
  0x1d   :  { %p1615_p10 = scmp.ne.s32.totalorder %s58_s28, %s1614_s4  ;;  %p1620_p12 = scmp.lt.s32.totalorder %s1614_s4, %s1614_s4 }
  0x1f   :  { %p1621_p13 = por %p1620_p12, %p1619_p11 }
  0x21   :  { %p1622_p0 = pnand %p1621_p13, %p1615_p10 }
  0x23   :  { %1625 = shalt.err (!%p1622_p0)
}
  0x24   :  { %63 = dma.hbm_to_vmem [thread:$0]  %s1844_s7, 6144, %s58_s28, [#allocation8], %s1653_s16, %s1653_s16, %s1654_s17  }
  0x25   :  { %1646 = dma.done.wait [#allocation5], 4096  }
  0x26   :  { %1647 = vsyncadd [#allocation5], 4294963200 }
  0x27   :  { %1648 = dma.done.wait [#allocation8], 18432  }
  0x28   :  { %1649 = vsyncadd [#allocation8], 4294948864  ;;  %v1659_v0 = vmov 0.0   ;;  %v110_v1 = vld [vmem:[#allocation4 + $0xf8] sm:$0xff]  ;;  %v109_v2 = vld [vmem:[#allocation4 + $0xf0] sm:$0xff]  ;;  %vm259_vm0 = vcmask 1040384  }
  0x29   :  { %175 = vmatprep.mubr.f32.mxu0 %v1659_v0  ;;  %251 = vst [vmem:[#allocation2 + $0x8] sm:$0x1] %v1659_v0  ;;  %252 = vst [vmem:[#allocation2 + $0x38] sm:$0x1] %v1659_v0  ;;  %v108_v3 = vld [vmem:[#allocation4 + $0xe8] sm:$0xff]  ;;  %111 = vmatprep.subr.mxu0 %v110_v1  ;;  %v107_v4 = vld [vmem:[#allocation4 + $0xe0] sm:$0xff] }
  0x2a   :  { %253 = vst [vmem:[#allocation2 + $0x29] sm:$0x1] %v1659_v0  ;;  %254 = vst [vmem:[#allocation2 + $0x59] sm:$0x1] %v1659_v0  ;;  %112 = vmatpush1.msra.mxu0 %v109_v2  ;;  %v106_v5 = vld [vmem:[#allocation4 + $0xd8] sm:$0xff]  ;;  %v105_v6 = vld [vmem:[#allocation4 + $0xd0] sm:$0xff] }
  0x2b   :  { %798 = vst [vmem:[#allocation3] sm:$0x1] %v1659_v0  ;;  %799 = vst [vmem:[#allocation3 + $0x18] sm:$0x1] %v1659_v0  ;;  %113 = vmatprep.subr.mxu0 %v108_v3  ;;  %v104_v7 = vld [vmem:[#allocation4 + $0xc8] sm:$0xff]  ;;  %v103_v8 = vld [vmem:[#allocation4 + $0xc0] sm:$0xff] }
  0x2c   :  { %800 = vst [vmem:[#allocation3 + $0x11] sm:$0x1] %v1659_v0  ;;  %801 = vst [vmem:[#allocation3 + $0x29] sm:$0x1] %v1659_v0  ;;  %114 = vmatpush1.msra.mxu0 %v107_v4  ;;  %v102_v9 = vld [vmem:[#allocation4 + $0xb8] sm:$0xff]  ;;  %v101_v10 = vld [vmem:[#allocation4 + $0xb0] sm:$0xff] }
  0x2d   :  { %115 = vmatprep.subr.mxu0 %v106_v5  ;;  %v100_v11 = vld [vmem:[#allocation4 + $0xa8] sm:$0xff]  ;;  %v99_v12 = vld [vmem:[#allocation4 + $0xa0] sm:$0xff]  ;;  %v98_v13 = vld [vmem:[#allocation4 + $0x98] sm:$0xff]  ;;  %vm338_vm1 = vcmask 1046528   ;;  %vm586_vm2 = vcmask 1045504   ;;  %s1661_s2 = smov [#allocation10]  }
  0x2e   :  { %116 = vmatpush1.msra.mxu0 %v105_v6  ;;  %v97_v14 = vld [vmem:[#allocation4 + $0x90] sm:$0xff]  ;;  %v96_v15 = vld [vmem:[#allocation4 + $0x88] sm:$0xff]  ;;  %v399_v16 = vld [vmem:[#allocation7 + $0x1f8] sm:$0xff]  ;;  %s1196_s7 = sshll.u32 %s1661_s2, 4  ;;  %s1197_s7 = int_to_ptr.vmem [resolvable:$true] %s1196_s7 }
  0x2f   :  { %117 = vmatprep.subr.mxu0 %v104_v7  ;;  %v95_v17 = vld [vmem:[#allocation4 + $0x80] sm:$0xff]  ;;  %1214 = vmatprep.subr.mxu1 %v399_v16  ;;  %v383_v18 = vld [vmem:[#allocation7 + $0x178] sm:$0xff]  ;;  %v398_v19 = vld [vmem:[#allocation7 + $0x1f0] sm:$0xff]  ;;  %p1631_p2 = scmp.lt.s32.totalorder %s1197_s7, %s1197_s7 }
  0x30   :  { %118 = vmatpush1.msra.mxu0 %v103_v8  ;;  %v94_v20 = vld [vmem:[#allocation4 + $0x78] sm:$0xff]  ;;  %1215 = vmatpush3.msra.mxu1 %v383_v18  ;;  %v382_v21 = vld [vmem:[#allocation7 + $0x170] sm:$0xff]  ;;  %v397_v23 = vld [vmem:[#allocation7 + $0x1e8] sm:$0xff] }
  0x31   :  { %119 = vmatprep.subr.mxu0 %v102_v9  ;;  %v93_v22 = vld [vmem:[#allocation4 + $0x70] sm:$0xff]  ;;  %1216 = vmatprep.subr.mxu1 %v398_v19  ;;  %v381_v24 = vld [vmem:[#allocation7 + $0x168] sm:$0xff]  ;;  %v396_v26 = vld [vmem:[#allocation7 + $0x1e0] sm:$0xff] }
  0x32   :  { %120 = vmatpush1.msra.mxu0 %v101_v10  ;;  %v92_v25 = vld [vmem:[#allocation4 + $0x68] sm:$0xff]  ;;  %1217 = vmatpush3.msra.mxu1 %v382_v21  ;;  %v91_v27 = vld [vmem:[#allocation4 + $0x60] sm:$0xff]  ;;  %v90_v29 = vld [vmem:[#allocation4 + $0x58] sm:$0xff] }
  0x33   :  { %121 = vmatprep.subr.mxu0 %v100_v11  ;;  %1218 = vmatprep.subr.mxu1 %v397_v23  ;;  %v380_v28 = vld [vmem:[#allocation7 + $0x160] sm:$0xff]  ;;  %v395_v30 = vld [vmem:[#allocation7 + $0x1d8] sm:$0xff]  ;;  %v89_v31 = vld [vmem:[#allocation4 + $0x50] sm:$0xff] }
  0x34   :  { %122 = vmatpush1.msra.mxu0 %v99_v12  ;;  %1219 = vmatpush3.msra.mxu1 %v381_v24  ;;  %v88_v32 = vld [vmem:[#allocation4 + $0x48] sm:$0xff]  ;;  %v87_v33 = vld [vmem:[#allocation4 + $0x40] sm:$0xff]  ;;  %v86_v34 = vld [vmem:[#allocation4 + $0x38] sm:$0xff] }
  0x35   :  { %123 = vmatprep.subr.mxu0 %v98_v13  ;;  %1220 = vmatprep.subr.mxu1 %v396_v26  ;;  %v85_v35 = vld [vmem:[#allocation4 + $0x30] sm:$0xff]  ;;  %v84_v36 = vld [vmem:[#allocation4 + $0x28] sm:$0xff]  ;;  %v83_v37 = vld [vmem:[#allocation4 + $0x20] sm:$0xff] }
  0x36   :  { %124 = vmatpush1.msra.mxu0 %v97_v14  ;;  %1221 = vmatpush3.msra.mxu1 %v380_v28  ;;  %v82_v38 = vld [vmem:[#allocation4 + $0x18] sm:$0xff]  ;;  %v81_v39 = vld [vmem:[#allocation4 + $0x10] sm:$0xff]  ;;  %v80_v40 = vld [vmem:[#allocation4 + $0x8] sm:$0xff] }
  0x37   :  { %125 = vmatprep.subr.mxu0 %v96_v15  ;;  %1222 = vmatprep.subr.mxu1 %v395_v30  ;;  %v79_v41 = vld [vmem:[#allocation4] sm:$0xff]  ;;  %v77_v42 = vld [vmem:[%s1837_s0] sm:$0xff]  ;;  %v317_v43 = vld [vmem:[#allocation7 + $0xf8] sm:$0xff] }
  0x38   :  { %126 = vmatpush1.msra.mxu0 %v95_v17  ;;  %v301_v44 = vld [vmem:[#allocation7 + $0x78] sm:$0xff]  ;;  %v316_v45 = vld [vmem:[#allocation7 + $0xf0] sm:$0xff]  ;;  %v315_v48 = vld [vmem:[#allocation7 + $0xe8] sm:$0xff] }
  0x39   :  { %127 = vmatprep.subr.mxu0 %v94_v20  ;;  %v300_v46 = vld [vmem:[#allocation7 + $0x70] sm:$0xff]  ;;  %v78_v47 = vld [vmem:[%s1837_s0 + $0x8] sm:$0xff]  ;;  %v299_v49 = vld [vmem:[#allocation7 + $0x68] sm:$0xff] }
  0x3a   :  { %128 = vmatpush1.msra.mxu0 %v93_v22  ;;  %v314_v50 = vld [vmem:[#allocation7 + $0xe0] sm:$0xff]  ;;  %v313_v52 = vld [vmem:[#allocation7 + $0xd8] sm:$0xff]  ;;  %v312_v54 = vld [vmem:[#allocation7 + $0xd0] sm:$0xff] }
  0x3b   :  { %129 = vmatprep.subr.mxu0 %v92_v25  ;;  %v298_v51 = vld [vmem:[#allocation7 + $0x60] sm:$0xff]  ;;  %v297_v53 = vld [vmem:[#allocation7 + $0x58] sm:$0xff]  ;;  %v296_v55 = vld [vmem:[#allocation7 + $0x50] sm:$0xff] }
  0x3c   :  { %130 = vmatpush1.msra.mxu0 %v91_v27  ;;  %v379_v56 = vld [vmem:[#allocation7 + $0x158] sm:$0xff]  ;;  %v311_v57 = vld [vmem:[#allocation7 + $0xc8] sm:$0xff]  ;;  %v394_v58 = vld [vmem:[#allocation7 + $0x1d0] sm:$0xff] }
  0x3d   :  { %131 = vmatprep.subr.mxu0 %v90_v29  ;;  %1223 = vmatpush3.msra.mxu1 %v379_v56  ;;  %v295_v59 = vld [vmem:[#allocation7 + $0x48] sm:$0xff]  ;;  %v378_v60 = vld [vmem:[#allocation7 + $0x150] sm:$0xff]  ;;  %v310_v61 = vld [vmem:[#allocation7 + $0xc0] sm:$0xff] }
  0x3e   :  { %132 = vmatpush1.msra.mxu0 %v89_v31  ;;  %1224 = vmatprep.subr.mxu1 %v394_v58  ;;  %v393_v62 = vld [vmem:[#allocation7 + $0x1c8] sm:$0xff]  ;;  %v294_v63 = vld [vmem:[#allocation7 + $0x40] sm:$0xff]  ;;  %v309_v1 = vld [vmem:[#allocation7 + $0xb8] sm:$0xff] }
  0x3f   :  { %133 = vmatprep.subr.mxu0 %v88_v32  ;;  %1225 = vmatpush3.msra.mxu1 %v378_v60  ;;  %v392_v2 = vld [vmem:[#allocation7 + $0x1c0] sm:$0xff]  ;;  %v293_v3 = vld [vmem:[#allocation7 + $0x38] sm:$0xff]  ;;  %v308_v5 = vld [vmem:[#allocation7 + $0xb0] sm:$0xff] }
  0x40   :  { %134 = vmatpush1.msra.mxu0 %v87_v33  ;;  %1226 = vmatprep.subr.mxu1 %v393_v62  ;;  %v376_v4 = vld [vmem:[#allocation7 + $0x140] sm:$0xff]  ;;  %v391_v6 = vld [vmem:[#allocation7 + $0x1b8] sm:$0xff]  ;;  %v292_v7 = vld [vmem:[#allocation7 + $0x30] sm:$0xff] }
  0x41   :  { %135 = vmatprep.subr.mxu0 %v86_v34  ;;  %v375_v8 = vld [vmem:[#allocation7 + $0x138] sm:$0xff]  ;;  %v307_v9 = vld [vmem:[#allocation7 + $0xa8] sm:$0xff]  ;;  %v390_v10 = vld [vmem:[#allocation7 + $0x1b0] sm:$0xff] }
  0x42   :  { %136 = vmatpush1.msra.mxu0 %v85_v35  ;;  %v291_v11 = vld [vmem:[#allocation7 + $0x28] sm:$0xff]  ;;  %v374_v12 = vld [vmem:[#allocation7 + $0x130] sm:$0xff]  ;;  %v306_v13 = vld [vmem:[#allocation7 + $0xa0] sm:$0xff] }
  0x43   :  { %137 = vmatprep.subr.mxu0 %v84_v36  ;;  %v389_v14 = vld [vmem:[#allocation7 + $0x1a8] sm:$0xff]  ;;  %v290_v15 = vld [vmem:[#allocation7 + $0x20] sm:$0xff]  ;;  %v305_v17 = vld [vmem:[#allocation7 + $0x98] sm:$0xff] }
  0x44   :  { %138 = vmatpush1.msra.mxu0 %v83_v37  ;;  %v373_v16 = vld [vmem:[#allocation7 + $0x128] sm:$0xff]  ;;  %v388_v18 = vld [vmem:[#allocation7 + $0x1a0] sm:$0xff]  ;;  %v1751_v19 = vld [vmem:[%s1838_s1] sm:$0xff] }
  0x45   :  { %139 = vmatprep.subr.mxu0 %v82_v38  ;;  %v289_v20 = vld [vmem:[#allocation7 + $0x18] sm:$0xff]  ;;  %v372_v21 = vld [vmem:[#allocation7 + $0x120] sm:$0xff]  ;;  %245 = vst [vmem:[#allocation2] sm:$0xff] %v1751_v19  ;;  %v304_v22 = vld [vmem:[#allocation7 + $0x90] sm:$0xff] }
  0x46   :  { %140 = vmatpush1.msra.mxu0 %v81_v39  ;;  %v387_v23 = vld [vmem:[#allocation7 + $0x198] sm:$0xff]  ;;  %v288_v24 = vld [vmem:[#allocation7 + $0x10] sm:$0xff]  ;;  %v303_v26 = vld [vmem:[#allocation7 + $0x88] sm:$0xff] }
  0x47   :  { %141 = vmatprep.subr.mxu0 %v80_v40  ;;  %v371_v25 = vld [vmem:[#allocation7 + $0x118] sm:$0xff]  ;;  %v386_v27 = vld [vmem:[#allocation7 + $0x190] sm:$0xff]  ;;  %v287_v28 = vld [vmem:[#allocation7 + $0x8] sm:$0xff] }
  0x48   :  { %142 = vmatpush1.msra.mxu0 %v79_v41  ;;  %v370_v29 = vld [vmem:[#allocation7 + $0x110] sm:$0xff]  ;;  %v302_v30 = vld [vmem:[#allocation7 + $0x80] sm:$0xff]  ;;  %v385_v31 = vld [vmem:[#allocation7 + $0x188] sm:$0xff] }
  0x49   :  { %176 = vmatmul.mubr.f32.vlgmr.msra.gmra.mxu0 %v77_v42  ;;  %1258 = vmatprep.subr.mxu0 %v317_v43  ;;  %v286_v32 = vld [vmem:[#allocation7] sm:$0xff]  ;;  %v369_v34 = vld [vmem:[#allocation7 + $0x108] sm:$0xff]  ;;  %v1760_v36 = vld [vmem:[%s1838_s1 + $0x8] sm:$0xff]  ;;  %v1660_v42 = vmov 1935823168  }
  0x4a   :  { %181 = vmatprep.mubr.f32.mxu0 %v1659_v0  ;;  %1259 = vmatpush3.msra.mxu0 %v301_v44  ;;  %v377_v0 = vld [vmem:[#allocation7 + $0x148] sm:$0xff]  ;;  %v241_v33 = vld [vmem:[%s1838_s1 + $0x10] sm:$0x3]  ;;  %v647_v39 = vld [vmem:[#allocation7 + $0x2f8] sm:$0xff]  ;;  %v201_v43 = vunpack.c.l.s4 %v1660_v42  ;;  %v203_v44 = vlaneseq }
  0x4b   :  { %1260 = vmatprep.subr.mxu0 %v316_v45  ;;  %1227 = vmatpush3.msra.mxu1 %v377_v0  ;;  %247 = vst [vmem:[#allocation2 + $0x20] sm:$0x3] %v241_v33  ;;  %v384_v35 = vld [vmem:[#allocation7 + $0x180] sm:$0xff]  ;;  %v1765_v38 = vld [vmem:[%s1838_s1 + $0x18] sm:$0xff]  ;;  %v244_v40 = vld [vmem:[%s1838_s1 + $0x28] sm:$0x3] }
  0x4c   :  { %1261 = vmatpush3.msra.mxu0 %v300_v46  ;;  %1228 = vmatprep.subr.mxu1 %v392_v2  ;;  %v368_v37 = vld [vmem:[#allocation7 + $0x100] sm:$0xff]  ;;  %248 = vst [vmem:[#allocation2 + $0x30] sm:$0xff] %v1765_v38  ;;  %250 = vst [vmem:[#allocation2 + $0x50] sm:$0x3] %v244_v40  ;;  %v1774_v41 = vld [vmem:[%s1838_s1 + $0x20] sm:$0xff]  ;;  %v202_v45 = vunpack.c.0.s8 %v201_v43  ;;  %v204_v46 = vshrl.u32 %v203_v44, 7 }
  0x4d   :  { %182 = vmatmul.mubr.f32.gmra.mxu0 %v78_v47  ;;  %1262 = vmatprep.subr.mxu0 %v315_v48  ;;  %v350_v33 = vrot.slane %v1774_v41, 1  ;;  %v644_v40 = vld [vmem:[#allocation7 + $0x2e0] sm:$0xff]  ;;  %v643_v43 = vld [vmem:[#allocation7 + $0x2d8] sm:$0xff] }
  0x4e   :  { %1263 = vmatpush3.msra.mxu0 %v299_v49  ;;  %1229 = vmatpush3.msra.mxu1 %v376_v4  ;;  %v205_v48 = vsub.s32 %v202_v45, %v204_v46  ;;  %v628_v42 = vld [vmem:[#allocation7 + $0x260] sm:$0xff] }
  0x4f   :  { %1264 = vmatprep.subr.mxu0 %v314_v50  ;;  %1230 = vmatprep.subr.mxu1 %v391_v6  ;;  %v318_v6 = vld [vmem:[#allocation2] sm:$0xfe] }
  0x50   :  { %1265 = vmatpush3.msra.mxu0 %v298_v51  ;;  %1231 = vmatpush3.msra.mxu1 %v375_v8  ;;  %v339_v8 = vrot.slane %v318_v6, 1  ;;  %v618_v6 = vld [vmem:[#allocation7 + $0x210] sm:$0xff] }
  0x51   :  { %1266 = vmatprep.subr.mxu0 %v313_v52  ;;  %1232 = vmatprep.subr.mxu1 %v390_v10  ;;  %v1209_v52 = vld [vmem:[%s1840_s3] ss:$0 sm:$0xff] }
  0x52   :  { %1267 = vmatpush3.msra.mxu0 %v297_v53  ;;  %1233 = vmatpush3.msra.mxu1 %v374_v12  ;;  %v320_v10 = vld [vmem:[#allocation2 + $0x20] sm:$0x1] }
  0x53   :  { %1268 = vmatprep.subr.mxu0 %v312_v54  ;;  %1234 = vmatprep.subr.mxu1 %v389_v14 }
  0x54   :  { %1269 = vmatpush3.msra.mxu0 %v296_v55  ;;  %1235 = vmatpush3.msra.mxu1 %v373_v16 }
  0x55   :  { %1270 = vmatprep.subr.mxu0 %v311_v57  ;;  %1236 = vmatprep.subr.mxu1 %v388_v18  ;;  %v345_v18 = vrot.slane %v320_v10, 1  ;;  %v588_v10 = vrot.slane %v1760_v36, 2 }
  0x56   :  { %1271 = vmatpush3.msra.mxu0 %v295_v59  ;;  %1237 = vmatpush3.msra.mxu1 %v372_v21  ;;  %v631_v21 = vld [vmem:[#allocation7 + $0x278] sm:$0xff] }
  0x57   :  { %1272 = vmatprep.subr.mxu0 %v310_v61  ;;  %1238 = vmatprep.subr.mxu1 %v387_v23  ;;  %v322_v23 = vld [vmem:[#allocation2 + $0x30] sm:$0xfe] }
  0x58   :  { %1273 = vmatpush3.msra.mxu0 %v294_v63  ;;  %1239 = vmatpush3.msra.mxu1 %v371_v25 }
  0x59   :  { %1274 = vmatprep.subr.mxu0 %v309_v1  ;;  %1240 = vmatprep.subr.mxu1 %v386_v27 }
  0x5a   :  { %1275 = vmatpush3.msra.mxu0 %v293_v3  ;;  %1241 = vmatpush3.msra.mxu1 %v370_v29 }
  0x5b   :  { %1276 = vmatprep.subr.mxu0 %v308_v5  ;;  %1242 = vmatprep.subr.mxu1 %v385_v31 }
  0x5c   :  { %1277 = vmatpush3.msra.mxu0 %v292_v7  ;;  %1243 = vmatpush3.msra.mxu1 %v369_v34  ;;  %v629_v34 = vld [vmem:[#allocation7 + $0x268] sm:$0xff] }
  0x5d   :  { %1278 = vmatprep.subr.mxu0 %v307_v9  ;;  %1244 = vmatprep.subr.mxu1 %v384_v35  ;;  %v340_v9 = vrot.slane %v1760_v36, 1 }
  0x5e   :  { %1279 = vmatpush3.msra.mxu0 %v291_v11  ;;  %1245 = vmatpush3.msra.mxu1 %v368_v37 }
  0x5f   :  { %1280 = vmatprep.subr.mxu0 %v306_v13  ;;  %1302 = vmatprep.subr.mxu1 %v647_v39  ;;  %v346_v31 = vsel %vm338_vm1, %v340_v9, %v345_v18  ;;  %v324_v39 = vld [vmem:[#allocation2 + $0x50] sm:$0x1] }
  0x60   :  { %1281 = vmatpush3.msra.mxu0 %v290_v15  ;;  %v355_v45 = vrot.slane %v324_v39, 1  ;;  %v842_v39 = vld [vmem:[#allocation9 + $0xd8] sm:$0xff] }
  0x61   :  { %1282 = vmatprep.subr.mxu0 %v305_v17  ;;  %v341_v17 = vsel %vm338_vm1, %v339_v8, %v340_v9  ;;  %v633_v8 = vld [vmem:[#allocation7 + $0x288] sm:$0xff] }
  0x62   :  { %1283 = vmatpush3.msra.mxu0 %v289_v20 }
  0x63   :  { %1284 = vmatprep.subr.mxu0 %v304_v22 }
  0x64   :  { %1285 = vmatpush3.msra.mxu0 %v288_v24  ;;  %v646_v24 = vld [vmem:[#allocation7 + $0x2f0] sm:$0xff] }
  0x65   :  { %1286 = vmatprep.subr.mxu0 %v303_v26 }
  0x66   :  { %1287 = vmatpush3.msra.mxu0 %v287_v28  ;;  %v630_v28 = vld [vmem:[#allocation7 + $0x270] sm:$0xff] }
  0x67   :  { %1288 = vmatprep.subr.mxu0 %v302_v30  ;;  %v645_v30 = vld [vmem:[#allocation7 + $0x2e8] sm:$0xff] }
  0x68   :  { %1289 = vmatpush3.msra.mxu0 %v286_v32  ;;  %v349_v32 = vrot.slane %v322_v23, 1 }
  0x6a   :  { %v351_v44 = vsel %vm338_vm1, %v349_v32, %v350_v33 }
 0x109   :  { %v177_v47 = vpop.f32.mrf.mxu0 }
 0x10b   :  { %v179_v49 = vpop.f32.mrf.mxu0 }
 0x10c   :  { %v192_v50 = vcombine.low %v177_v47, %v179_v49  ;;  %v193_v51 = vcombine.high %v177_v47, %v179_v49  ;;  %v627_v47 = vld [vmem:[#allocation7 + $0x258] sm:$0xff]  ;;  %v642_v49 = vld [vmem:[#allocation7 + $0x2d0] sm:$0xff] }
 0x10d   :  { %v183_v53 = vpop.f32.mrf.mxu0 }
 0x10e   :  { %v206_v54 = vrot.slane %v192_v50, %v205_v48  ;;  %v213_v55 = vrot.slane %v193_v51, %v205_v48  ;;  %v626_v50 = vld [vmem:[#allocation7 + $0x250] sm:$0xff] }
 0x10f   :  { %v185_v56 = vpop.f32.mrf.mxu0 }
 0x110   :  { %v235_v57 = vadd.f32 %v1209_v52, %v206_v54  ;;  %v236_v58 = vadd.f32 %v1209_v52, %v213_v55  ;;  %v194_v59 = vcombine.low %v183_v53, %v185_v56  ;;  %v195_v60 = vcombine.high %v183_v53, %v185_v56  ;;  %v625_v55 = vld [vmem:[#allocation7 + $0x248] sm:$0xff] }
 0x111   :  { %v356_v53 = vsel %vm338_vm1, %v350_v33, %v355_v45  ;;  %v846_v33 = vld [vmem:[#allocation9 + $0xf8] sm:$0xff]  ;;  %v822_v45 = vld [vmem:[#allocation9 + $0x60] sm:$0xff] }
 0x112   :  { %v260_v61 = vrot.slane %v235_v57, 7  ;;  %v261_v62 = vrot.slane %v236_v58, 7  ;;  %v220_v63 = vrot.slane %v194_v59, %v205_v48  ;;  %v227_v0 = vrot.slane %v195_v60, %v205_v48  ;;  %v624_v57 = vld [vmem:[#allocation7 + $0x240] sm:$0xff]  ;;  %v639_v58 = vld [vmem:[#allocation7 + $0x2b8] sm:$0xff]  ;;  %v638_v60 = vld [vmem:[#allocation7 + $0x2b0] sm:$0xff]  ;;  %1406 = vmatprep.subr.mxu0 %v846_v33 }
 0x113   :  { %v623_v59 = vld [vmem:[#allocation7 + $0x238] sm:$0xff] }
 0x114   :  { %v1779_v1 = vsel %vm259_vm0, %v260_v61, %v261_v62  ;;  %272 = vst [vmem:[#allocation2 + $0x8] sm:$0xfe] %v260_v61  ;;  %274 = vst [vmem:[#allocation2 + $0x28] sm:$0x1] %v261_v62  ;;  %v237_v2 = vadd.f32 %v1209_v52, %v220_v63  ;;  %v238_v3 = vadd.f32 %v1209_v52, %v227_v0  ;;  %v641_v52 = vld [vmem:[#allocation7 + $0x2c8] sm:$0xff]  ;;  %v622_v61 = vld [vmem:[#allocation7 + $0x230] sm:$0xff] }
 0x115   :  { %v343_v14 = vrot.slane %v1779_v1, 1  ;;  %v591_v54 = vrot.slane %v1779_v1, 2  ;;  %v637_v62 = vld [vmem:[#allocation7 + $0x2a8] sm:$0xff]  ;;  %v636_v0 = vld [vmem:[#allocation7 + $0x2a0] sm:$0xff] }
 0x116   :  { %v263_v4 = vrot.slane %v237_v2, 7  ;;  %v264_v5 = vrot.slane %v238_v3, 7  ;;  %v621_v63 = vld [vmem:[#allocation7 + $0x228] sm:$0xff]  ;;  %v635_v2 = vld [vmem:[#allocation7 + $0x298] sm:$0xff] }
 0x117   :  { %v619_v3 = vld [vmem:[#allocation7 + $0x218] sm:$0xff] }
 0x118   :  { %v1781_v7 = vsel %vm259_vm0, %v263_v4, %v264_v5  ;;  %275 = vst [vmem:[#allocation2 + $0x38] sm:$0xfe] %v263_v4  ;;  %277 = vst [vmem:[#allocation2 + $0x58] sm:$0x1] %v264_v5  ;;  %v570_v4 = vld [vmem:[#allocation2] sm:$0xfc] }
 0x119   :  { %v353_v22 = vrot.slane %v1781_v7, 1  ;;  %v634_v5 = vld [vmem:[#allocation7 + $0x290] sm:$0xff]  ;;  %v587_v9 = vrot.slane %v570_v4, 2  ;;  %v601_v23 = vrot.slane %v1781_v7, 2 }
 0x11b   :  { %v279_v11 = vld [vmem:[#allocation2 + $0x8] sm:$0xff] }
 0x11c   :  { %v319_v12 = vld [vmem:[#allocation2 + $0x8] sm:$0xfe]  ;;  %v321_v13 = vld [vmem:[#allocation2 + $0x28] sm:$0x1]  ;;  %549 = vmatprep.mubr.f32.mxu0 %v279_v11 }
 0x11d   :  { %v342_v15 = vrot.slane %v319_v12, 1  ;;  %v347_v16 = vrot.slane %v321_v13, 1  ;;  %550 = vmatmul.mubr.f32.vlgmr.msra.gmra.mxu0 %v1751_v19  ;;  %v571_v46 = vld [vmem:[#allocation2 + $0x8] sm:$0xfc]  ;;  %v573_v11 = vld [vmem:[#allocation2 + $0x28] sm:$0x3] }
 0x11e   :  { %554 = vmatprep.mubr.f32.mxu0 %v1779_v1  ;;  %v590_v51 = vrot.slane %v571_v46, 2  ;;  %v620_v1 = vld [vmem:[#allocation7 + $0x220] sm:$0xff]  ;;  %v617_v12 = vld [vmem:[#allocation7 + $0x208] sm:$0xff]  ;;  %v572_v13 = vld [vmem:[#allocation2 + $0x20] sm:$0x3]  ;;  %1407 = vmatpush3.msra.mxu0 %v846_v33 }
 0x11f   :  { %v344_v20 = vsel %vm338_vm1, %v342_v15, %v343_v14  ;;  %v323_v25 = vld [vmem:[#allocation2 + $0x38] sm:$0xfe]  ;;  %v325_v26 = vld [vmem:[#allocation2 + $0x58] sm:$0x1]  ;;  %v348_v27 = vsel %vm338_vm1, %v343_v14, %v347_v16  ;;  %v632_v14 = vld [vmem:[#allocation7 + $0x280] sm:$0xff]  ;;  %v595_v16 = vrot.slane %v573_v11, 2 }
 0x120   :  { %464 = vmatprep.mubr.f32.mxu1 %v344_v20  ;;  %v352_v19 = vrot.slane %v323_v25, 1  ;;  %v283_v29 = vld [vmem:[#allocation2 + $0x38] sm:$0xff]  ;;  %v357_v37 = vrot.slane %v325_v26, 1  ;;  %v592_v56 = vsel %vm586_vm2, %v590_v51, %v591_v54  ;;  %v616_v15 = vld [vmem:[#allocation7 + $0x200] sm:$0xff]  ;;  %v593_v18 = vrot.slane %v572_v13, 2 }
 0x121   :  { %465 = vmatmul.mubr.f32.vlgmr.msra.gmra.mxu1 %v341_v17  ;;  %555 = vmatmul.mubr.f32.gmra.mxu0 %v1760_v36  ;;  %v589_v17 = vsel %vm586_vm2, %v587_v9, %v588_v10  ;;  %v575_v20 = vld [vmem:[#allocation2 + $0x38] sm:$0xfc]  ;;  %v596_v36 = vsel %vm586_vm2, %v591_v54, %v595_v16  ;;  %v598_v26 = vrot.slane %v1774_v41, 2  ;;  %v839_v46 = vld [vmem:[#allocation9 + $0xc0] sm:$0xff] }
 0x122   :  { %1303 = vmatpush3.msra.mxu1 %v631_v21  ;;  %469 = vmatprep.mubr.f32.mxu1 %v348_v27  ;;  %v354_v35 = vsel %vm338_vm1, %v352_v19, %v353_v22  ;;  %v358_v48 = vsel %vm338_vm1, %v353_v22, %v357_v37  ;;  %v574_v21 = vld [vmem:[#allocation2 + $0x30] sm:$0xfc]  ;;  %v600_v22 = vrot.slane %v575_v20, 2  ;;  %v577_v27 = vld [vmem:[#allocation2 + $0x58] sm:$0x3]  ;;  %v825_v37 = vld [vmem:[#allocation9 + $0x78] sm:$0xff] }
 0x123   :  { %1304 = vmatprep.subr.mxu1 %v646_v24  ;;  %559 = vmatprep.mubr.f32.mxu0 %v283_v29  ;;  %v594_v24 = vsel %vm586_vm2, %v588_v10, %v593_v18  ;;  %v597_v25 = vrot.slane %v574_v21, 2  ;;  %v605_v29 = vrot.slane %v577_v27, 2  ;;  %v819_v51 = vld [vmem:[#allocation9 + $0x48] sm:$0xff]  ;;  %v835_v54 = vld [vmem:[#allocation9 + $0xa0] sm:$0xff] }
 0x124   :  { %1305 = vmatpush3.msra.mxu1 %v630_v28  ;;  %v576_v28 = vld [vmem:[#allocation2 + $0x50] sm:$0x3]  ;;  %v602_v19 = vsel %vm586_vm2, %v600_v22, %v601_v23 }
 0x125   :  { %1306 = vmatprep.subr.mxu1 %v645_v30  ;;  %470 = vmatmul.mubr.f32.gmra.mxu1 %v346_v31  ;;  %v599_v30 = vsel %vm586_vm2, %v597_v25, %v598_v26  ;;  %v603_v31 = vrot.slane %v576_v28, 2  ;;  %v606_v32 = vsel %vm586_vm2, %v601_v23, %v605_v29 }
 0x126   :  { %1307 = vmatpush3.msra.mxu1 %v629_v34  ;;  %474 = vmatprep.mubr.f32.mxu1 %v354_v35  ;;  %v844_v34 = vld [vmem:[#allocation9 + $0xe8] sm:$0xff]  ;;  %v843_v35 = vld [vmem:[#allocation9 + $0xe0] sm:$0xff] }
 0x127   :  { %1308 = vmatprep.subr.mxu1 %v644_v40  ;;  %560 = vmatmul.mubr.f32.gmra.mxu0 %v1765_v38  ;;  %v640_v38 = vld [vmem:[#allocation7 + $0x2c0] sm:$0xff]  ;;  %v824_v40 = vld [vmem:[#allocation9 + $0x70] sm:$0xff] }
 0x128   :  { %1309 = vmatpush3.msra.mxu1 %v628_v42  ;;  %564 = vmatprep.mubr.f32.mxu0 %v1781_v7  ;;  %v604_v7 = vsel %vm586_vm2, %v598_v26, %v603_v31  ;;  %v841_v42 = vld [vmem:[#allocation9 + $0xd0] sm:$0xff] }
 0x129   :  { %1310 = vmatprep.subr.mxu1 %v643_v43  ;;  %475 = vmatmul.mubr.f32.gmra.mxu1 %v351_v44  ;;  %v823_v43 = vld [vmem:[#allocation9 + $0x68] sm:$0xff] }
 0x12a   :  { %1311 = vmatpush3.msra.mxu1 %v627_v47  ;;  %479 = vmatprep.mubr.f32.mxu1 %v358_v48  ;;  %v840_v44 = vld [vmem:[#allocation9 + $0xc8] sm:$0xff]  ;;  %v821_v47 = vld [vmem:[#allocation9 + $0x58] sm:$0xff] }
 0x12b   :  { %1312 = vmatprep.subr.mxu1 %v642_v49  ;;  %565 = vmatmul.mubr.f32.gmra.mxu0 %v1774_v41  ;;  %v845_v41 = vld [vmem:[#allocation9 + $0xf0] sm:$0xff]  ;;  %v838_v48 = vld [vmem:[#allocation9 + $0xb8] sm:$0xff] }
 0x12c   :  { %1313 = vmatpush3.msra.mxu1 %v626_v50  ;;  %1408 = vmatprep.subr.mxu0 %v845_v41  ;;  %v820_v49 = vld [vmem:[#allocation9 + $0x50] sm:$0xff] }
 0x12d   :  { %1314 = vmatprep.subr.mxu1 %v641_v52  ;;  %480 = vmatmul.mubr.f32.gmra.mxu1 %v356_v53  ;;  %v837_v50 = vld [vmem:[#allocation9 + $0xb0] sm:$0xff]  ;;  %v836_v52 = vld [vmem:[#allocation9 + $0xa8] sm:$0xff]  ;;  %v818_v53 = vld [vmem:[#allocation9 + $0x40] sm:$0xff] }
 0x12e   :  { %1315 = vmatpush3.msra.mxu1 %v625_v55  ;;  %712 = vmatprep.mubr.f32.mxu1 %v592_v56  ;;  %v817_v55 = vld [vmem:[#allocation9 + $0x38] sm:$0xff]  ;;  %v816_v56 = vld [vmem:[#allocation9 + $0x30] sm:$0xff] }
 0x12f   :  { %1316 = vmatprep.subr.mxu1 %v640_v38  ;;  %1409 = vmatpush3.msra.mxu0 %v845_v41  ;;  %v834_v38 = vld [vmem:[#allocation9 + $0x98] sm:$0xff] }
 0x130   :  { %1317 = vmatpush3.msra.mxu1 %v624_v57  ;;  %1410 = vmatprep.subr.mxu0 %v844_v34  ;;  %v833_v57 = vld [vmem:[#allocation9 + $0x90] sm:$0xff] }
 0x131   :  { %1318 = vmatprep.subr.mxu1 %v639_v58  ;;  %1411 = vmatpush3.msra.mxu0 %v844_v34  ;;  %v815_v58 = vld [vmem:[#allocation9 + $0x28] sm:$0xff] }
 0x132   :  { %1319 = vmatpush3.msra.mxu1 %v623_v59  ;;  %1412 = vmatprep.subr.mxu0 %v843_v35  ;;  %v832_v59 = vld [vmem:[#allocation9 + $0x88] sm:$0xff] }
 0x133   :  { %1320 = vmatprep.subr.mxu1 %v638_v60  ;;  %1413 = vmatpush3.msra.mxu0 %v843_v35  ;;  %v814_v60 = vld [vmem:[#allocation9 + $0x20] sm:$0xff] }
 0x134   :  { %1321 = vmatpush3.msra.mxu1 %v622_v61  ;;  %1414 = vmatprep.subr.mxu0 %v842_v39  ;;  %v831_v61 = vld [vmem:[#allocation9 + $0x80] sm:$0xff] }
 0x135   :  { %1322 = vmatprep.subr.mxu1 %v637_v62  ;;  %1415 = vmatpush3.msra.mxu0 %v842_v39  ;;  %v813_v62 = vld [vmem:[#allocation9 + $0x18] sm:$0xff] }
 0x136   :  { %1323 = vmatpush3.msra.mxu1 %v621_v63  ;;  %1416 = vmatprep.subr.mxu0 %v841_v42  ;;  %v1813_v63 = vld [vmem:[#allocation9 + $0x178] sm:$0xff] }
 0x137   :  { %1324 = vmatprep.subr.mxu1 %v636_v0  ;;  %1417 = vmatpush3.msra.mxu0 %v841_v42  ;;  %v812_v0 = vld [vmem:[#allocation9 + $0x10] sm:$0xff] }
 0x138   :  { %1325 = vmatpush3.msra.mxu1 %v620_v1  ;;  %1418 = vmatprep.subr.mxu0 %v840_v44  ;;  %v811_v1 = vld [vmem:[#allocation9 + $0x8] sm:$0xff] }
 0x139   :  { %1326 = vmatprep.subr.mxu1 %v635_v2  ;;  %1419 = vmatpush3.msra.mxu0 %v840_v44  ;;  %v810_v2 = vld [vmem:[#allocation9] sm:$0xff] }
 0x13a   :  { %1327 = vmatpush3.msra.mxu1 %v619_v3  ;;  %1420 = vmatprep.subr.mxu0 %v839_v46 }
 0x13b   :  { %1328 = vmatprep.subr.mxu1 %v634_v5  ;;  %1421 = vmatpush3.msra.mxu0 %v839_v46 }
 0x13c   :  { %1329 = vmatpush3.msra.mxu1 %v618_v6  ;;  %1422 = vmatprep.subr.mxu0 %v838_v48 }
 0x13d   :  { %1330 = vmatprep.subr.mxu1 %v633_v8  ;;  %1423 = vmatpush3.msra.mxu0 %v838_v48 }
 0x13e   :  { %1331 = vmatpush3.msra.mxu1 %v617_v12  ;;  %1424 = vmatprep.subr.mxu0 %v837_v50 }
 0x13f   :  { %1332 = vmatprep.subr.mxu1 %v632_v14  ;;  %1425 = vmatpush3.msra.mxu0 %v837_v50 }
 0x140   :  { %1333 = vmatpush3.msra.mxu1 %v616_v15  ;;  %1426 = vmatprep.subr.mxu0 %v836_v52 }
 0x141   :  { %713 = vmatmul.mubr.f32.vlgmr.msra.gmra.mxu1 %v589_v17  ;;  %1444 = vmatprep.subr.mxu1 %v825_v37 }
 0x142   :  { %717 = vmatprep.mubr.f32.mxu1 %v596_v36  ;;  %1445 = vmatpush3.msra.mxu1 %v825_v37 }
 0x143   :  { %1446 = vmatprep.subr.mxu1 %v824_v40  ;;  %1427 = vmatpush3.msra.mxu0 %v836_v52 }
 0x144   :  { %1447 = vmatpush3.msra.mxu1 %v824_v40  ;;  %1428 = vmatprep.subr.mxu0 %v835_v54 }
 0x145   :  { %718 = vmatmul.mubr.f32.gmra.mxu1 %v594_v24  ;;  %1448 = vmatprep.subr.mxu1 %v823_v43 }
 0x146   :  { %722 = vmatprep.mubr.f32.mxu1 %v602_v19  ;;  %1449 = vmatpush3.msra.mxu1 %v823_v43 }
 0x147   :  { %1450 = vmatprep.subr.mxu1 %v822_v45  ;;  %1429 = vmatpush3.msra.mxu0 %v835_v54 }
 0x148   :  { %1451 = vmatpush3.msra.mxu1 %v822_v45  ;;  %1430 = vmatprep.subr.mxu0 %v834_v38 }
 0x149   :  { %723 = vmatmul.mubr.f32.gmra.mxu1 %v599_v30  ;;  %1452 = vmatprep.subr.mxu1 %v821_v47 }
 0x14a   :  { %727 = vmatprep.mubr.f32.mxu1 %v606_v32  ;;  %1453 = vmatpush3.msra.mxu1 %v821_v47 }
 0x14b   :  { %1454 = vmatprep.subr.mxu1 %v820_v49  ;;  %1431 = vmatpush3.msra.mxu0 %v834_v38 }
 0x14c   :  { %1455 = vmatpush3.msra.mxu1 %v820_v49  ;;  %1432 = vmatprep.subr.mxu0 %v833_v57 }
 0x14d   :  { %728 = vmatmul.mubr.f32.gmra.mxu1 %v604_v7  ;;  %1456 = vmatprep.subr.mxu1 %v819_v51 }
 0x14e   :  { %1457 = vmatpush3.msra.mxu1 %v819_v51  ;;  %1433 = vmatpush3.msra.mxu0 %v833_v57 }
 0x14f   :  { %1458 = vmatprep.subr.mxu1 %v818_v53  ;;  %1434 = vmatprep.subr.mxu0 %v832_v59 }
 0x150   :  { %1459 = vmatpush3.msra.mxu1 %v818_v53  ;;  %1435 = vmatpush3.msra.mxu0 %v832_v59 }
 0x151   :  { %1460 = vmatprep.subr.mxu1 %v817_v55  ;;  %1436 = vmatprep.subr.mxu0 %v831_v61 }
 0x152   :  { %1461 = vmatpush3.msra.mxu1 %v817_v55  ;;  %1437 = vmatpush3.msra.mxu0 %v831_v61 }
 0x153   :  { %1462 = vmatprep.subr.mxu1 %v816_v56  ;;  %1482 = vmatprep.subr.mxu0 %v1813_v63 }
 0x154   :  { %1463 = vmatpush3.msra.mxu1 %v816_v56 }
 0x155   :  { %1464 = vmatprep.subr.mxu1 %v815_v58 }
 0x156   :  { %1465 = vmatpush3.msra.mxu1 %v815_v58 }
 0x157   :  { %1466 = vmatprep.subr.mxu1 %v814_v60 }
 0x158   :  { %1467 = vmatpush3.msra.mxu1 %v814_v60 }
 0x159   :  { %1468 = vmatprep.subr.mxu1 %v813_v62 }
 0x15a   :  { %1469 = vmatpush3.msra.mxu1 %v813_v62 }
 0x15b   :  { %1470 = vmatprep.subr.mxu1 %v812_v0 }
 0x15c   :  { %1471 = vmatpush3.msra.mxu1 %v812_v0 }
 0x15d   :  { %1472 = vmatprep.subr.mxu1 %v811_v1 }
 0x15e   :  { %1473 = vmatpush3.msra.mxu1 %v811_v1 }
 0x15f   :  { %1474 = vmatprep.subr.mxu1 %v810_v2 }
 0x160   :  { %1475 = vmatpush3.msra.mxu1 %v810_v2 }
 0x161   :  { %1520 = vmatprep.subr.mxu1 %v1813_v63 }
 0x1dd   :  { %v1290_v6 = vpop.f32.mrf.mxu0 }
 0x1df   :  { %v1291_v9 = vpop.f32.mrf.mxu0 }
 0x1e0   :  { %v1292_v25 = vadd.f32 %v1291_v9, %v1290_v6 }
 0x1e1   :  { %v1246_v3 = vpop.f32.mrf.mxu1  ;;  %v1293_v11 = vpop.f32.mrf.mxu0 }
 0x1e3   :  { %v1247_v4 = vpop.f32.mrf.mxu1  ;;  %v1294_v13 = vpop.f32.mrf.mxu0 }
 0x1e4   :  { %v1295_v23 = vadd.f32 %v1294_v13, %v1293_v11  ;;  %v1248_v24 = vadd.f32 %v1247_v4, %v1246_v3 }
 0x1e5   :  { %v1249_v5 = vpop.f32.mrf.mxu1 }
 0x1e6   :  { %v552_v7 = vadd.f32 %v1292_v25, %v1248_v24 }
 0x1e7   :  { %v1250_v8 = vpop.f32.mrf.mxu1  ;;  %v1296_v15 = vpop.f32.mrf.mxu0 }
 0x1e8   :  { %v1251_v22 = vadd.f32 %v1250_v8, %v1249_v5 }
 0x1e9   :  { %v1252_v10 = vpop.f32.mrf.mxu1  ;;  %v1297_v17 = vpop.f32.mrf.mxu0 }
 0x1ea   :  { %v1298_v27 = vadd.f32 %v1297_v17, %v1296_v15  ;;  %v557_v31 = vadd.f32 %v1295_v23, %v1251_v22  ;;  %v1210_v15 = vld [vmem:[%s1842_s5] ss:$0 sm:$0xff] }
 0x1eb   :  { %v1253_v12 = vpop.f32.mrf.mxu1  ;;  %v1299_v21 = vpop.f32.mrf.mxu0 }
 0x1ec   :  { %v1254_v26 = vadd.f32 %v1253_v12, %v1252_v10 }
 0x1ed   :  { %v1255_v14 = vpop.f32.mrf.mxu1  ;;  %v1300_v29 = vpop.f32.mrf.mxu0 }
 0x1ee   :  { %v562_v33 = vadd.f32 %v1298_v27, %v1254_v26  ;;  %v1301_v35 = vadd.f32 %v1300_v29, %v1299_v21  ;;  %v1211_v21 = vld [vmem:[%s1843_s6] ss:$0 sm:$0xff] }
 0x1ef   :  { %v1256_v16 = vpop.f32.mrf.mxu1 }
 0x1f0   :  { %v1257_v34 = vadd.f32 %v1256_v16, %v1255_v14 }
 0x1f2   :  { %v567_v45 = vadd.f32 %v1301_v35, %v1257_v34 }
 0x201   :  { %v1334_v18 = vpop.f32.mrf.mxu1 }
 0x203   :  { %v1335_v20 = vpop.f32.mrf.mxu1 }
 0x204   :  { %v1336_v32 = vadd.f32 %v1335_v20, %v1334_v18 }
 0x205   :  { %v1337_v36 = vpop.f32.mrf.mxu1 }
 0x206   :  { %v733_v42 = vadd.f32 %v1336_v32, %v552_v7  ;;  %v1036_v32 = vld [vmem:[#allocation9 + $0x170] sm:$0xff]  ;;  %v1035_v7 = vld [vmem:[#allocation9 + $0x168] sm:$0xff] }
 0x207   :  { %v1338_v28 = vpop.f32.mrf.mxu1 }
 0x208   :  { %v1339_v19 = vadd.f32 %v1338_v28, %v1337_v36 }
 0x209   :  { %v1340_v30 = vpop.f32.mrf.mxu1 }
 0x20a   :  { %v734_v37 = vadd.f32 %v1339_v19, %v557_v31 }
 0x20b   :  { %v1341_v41 = vpop.f32.mrf.mxu1 }
 0x20c   :  { %v1342_v39 = vadd.f32 %v1341_v41, %v1340_v30  ;;  %v739_v46 = vadd.f32 %v734_v37, %v733_v42 }
 0x20d   :  { %v1343_v40 = vpop.f32.mrf.mxu1 }
 0x20e   :  { %v735_v43 = vadd.f32 %v1342_v39, %v562_v33  ;;  %v1034_v33 = vld [vmem:[#allocation9 + $0x160] sm:$0xff] }
 0x20f   :  { %v1344_v44 = vpop.f32.mrf.mxu1 }
 0x210   :  { %v1345_v47 = vadd.f32 %v1344_v44, %v1343_v40  ;;  %v740_v48 = vadd.f32 %v739_v46, %v735_v43  ;;  %v1031_v44 = vld [vmem:[#allocation9 + $0x148] sm:$0xff]  ;;  %v1028_v46 = vld [vmem:[#allocation9 + $0x130] sm:$0xff] }
 0x212   :  { %v736_v49 = vadd.f32 %v1345_v47, %v567_v45  ;;  %v1030_v45 = vld [vmem:[#allocation9 + $0x140] sm:$0xff]  ;;  %v1027_v47 = vld [vmem:[#allocation9 + $0x128] sm:$0xff] }
 0x214   :  { %v741_v50 = vadd.f32 %v740_v48, %v736_v49  ;;  %v1026_v48 = vld [vmem:[#allocation9 + $0x120] sm:$0xff] }
 0x216   :  { %v742_v51 = vrot.slane %v741_v50, 4 }
 0x218   :  { %v743_v52 = vadd.f32 %v742_v51, %v741_v50  ;;  %v1024_v50 = vld [vmem:[#allocation9 + $0x110] sm:$0xff]  ;;  %v1023_v51 = vld [vmem:[#allocation9 + $0x108] sm:$0xff] }
 0x21a   :  { %v744_v53 = vrot.slane %v743_v52, 2 }
 0x21c   :  { %v745_v54 = vadd.f32 %v744_v53, %v743_v52  ;;  %v1022_v52 = vld [vmem:[#allocation9 + $0x100] sm:$0xff] }
 0x21e   :  { %v746_v55 = vrot.slane %v745_v54, 1 }
 0x220   :  { %v747_v38 = vadd.f32 %v746_v55, %v745_v54 }
 0x222   :  { %v749_v56 = vmul.f32 0.03125, %v747_v38 }
 0x224   :  { %v750_v57 = vsub.f32 %v733_v42, %v749_v56  ;;  %v751_v58 = vsub.f32 %v734_v37, %v749_v56  ;;  %v752_v59 = vsub.f32 %v735_v43, %v749_v56  ;;  %v753_v60 = vsub.f32 %v736_v49, %v749_v56  ;;  %v1033_v37 = vld [vmem:[#allocation9 + $0x158] sm:$0xff]  ;;  %v1032_v42 = vld [vmem:[#allocation9 + $0x150] sm:$0xff] }
 0x225   :  { %v1025_v49 = vld [vmem:[#allocation9 + $0x118] sm:$0xff] }
 0x226   :  { %v754_v61 = vmul.f32 %v750_v57, %v750_v57  ;;  %v755_v62 = vmul.f32 %v751_v58, %v751_v58  ;;  %v756_v0 = vmul.f32 %v752_v59, %v752_v59  ;;  %v757_v2 = vmul.f32 %v753_v60, %v753_v60 }
 0x228   :  { %v758_v1 = vadd.f32 %v755_v62, %v754_v61 }
 0x22a   :  { %v759_v3 = vadd.f32 %v758_v1, %v756_v0 }
 0x22c   :  { %v760_v4 = vadd.f32 %v759_v3, %v757_v2 }
 0x22e   :  { %v761_v5 = vrot.slane %v760_v4, 4 }
 0x230   :  { %v762_v6 = vadd.f32 %v761_v5, %v760_v4 }
 0x232   :  { %v763_v8 = vrot.slane %v762_v6, 2 }
 0x234   :  { %v764_v9 = vadd.f32 %v763_v8, %v762_v6 }
 0x236   :  { %v765_v10 = vrot.slane %v764_v9, 1 }
 0x238   :  { %v766_v11 = vadd.f32 %v765_v10, %v764_v9 }
 0x23a   :  { %v767_v12 = vmul.f32 0.03125, %v766_v11 }
 0x23c   :  { %v768_v13 = vadd.f32 1e-05, %v767_v12 }
 0x23e   :  { %1562 = vrsqrt.f32 %v768_v13 }
 0x24b   :  { %v1563_v14 = vpop.eup %1562 }
 0x24c   :  { %v770_v16 = vmul.f32 %v1563_v14, %v750_v57  ;;  %v771_v17 = vmul.f32 %v1563_v14, %v751_v58  ;;  %v772_v18 = vmul.f32 %v1563_v14, %v752_v59  ;;  %v773_v20 = vmul.f32 %v1563_v14, %v753_v60 }
 0x24e   :  { %v780_v36 = vmul.f32 %v1210_v15, %v770_v16  ;;  %v781_v22 = vmul.f32 %v1210_v15, %v771_v17  ;;  %v782_v23 = vmul.f32 %v1210_v15, %v772_v18  ;;  %v783_v24 = vmul.f32 %v1210_v15, %v773_v20 }
 0x250   :  { %v790_v25 = vadd.f32 %v1211_v21, %v780_v36  ;;  %v791_v26 = vadd.f32 %v1211_v21, %v781_v22  ;;  %v792_v27 = vadd.f32 %v1211_v21, %v782_v23  ;;  %v793_v28 = vadd.f32 %v1211_v21, %v783_v24 }
 0x252   :  { %v794_v19 = vmax.f32 %v790_v25, 0.0  ;;  %v795_v29 = vmax.f32 %v791_v26, 0.0  ;;  %v796_v30 = vmax.f32 %v792_v27, 0.0  ;;  %v797_v31 = vmax.f32 %v793_v28, 0.0 }
 0x254   :  { %802 = vst [vmem:[#allocation3 + $0x1] sm:$0xff] %v794_v19  ;;  %803 = vst [vmem:[#allocation3 + $0x9] sm:$0xff] %v795_v29  ;;  %1438 = vmatprep.mubr.f32.mxu0 %v794_v19 }
 0x255   :  { %804 = vst [vmem:[#allocation3 + $0x19] sm:$0xff] %v796_v30  ;;  %805 = vst [vmem:[#allocation3 + $0x21] sm:$0xff] %v797_v31  ;;  %1439 = vmatmul.mubr.f32.vlgmr.msra.gmra.mxu0 %v795_v29 }
 0x256   :  { %1483 = vmatpush3.msra.mxu0 %v1813_v63  ;;  %1441 = vmatprep.mubr.f32.mxu0 %v796_v30 }
 0x257   :  { %1484 = vmatprep.subr.mxu0 %v1036_v32 }
 0x258   :  { %1485 = vmatpush3.msra.mxu0 %v1036_v32 }
 0x259   :  { %1486 = vmatprep.subr.mxu0 %v1035_v7  ;;  %1442 = vmatmul.mubr.f32.gmra.mxu0 %v797_v31 }
 0x25a   :  { %1487 = vmatpush3.msra.mxu0 %v1035_v7 }
 0x25b   :  { %v806_v41 = vld [vmem:[#allocation3] sm:$0xff]  ;;  %v807_v34 = vld [vmem:[#allocation3 + $0x8] sm:$0xff]  ;;  %1488 = vmatprep.subr.mxu0 %v1034_v33 }
 0x25c   :  { %1476 = vmatprep.mubr.f32.mxu1 %v806_v41  ;;  %v1017_v35 = vld [vmem:[#allocation3 + $0x2] sm:$0xff]  ;;  %1489 = vmatpush3.msra.mxu0 %v1034_v33  ;;  %v808_v39 = vld [vmem:[#allocation3 + $0x18] sm:$0xff]  ;;  %v1018_v53 = vld [vmem:[#allocation3 + $0xa] sm:$0xff] }
 0x25d   :  { %1477 = vmatmul.mubr.f32.vlgmr.msra.gmra.mxu1 %v807_v34  ;;  %1514 = vmatprep.mubr.f32.mxu0 %v1017_v35  ;;  %v809_v40 = vld [vmem:[#allocation3 + $0x20] sm:$0xff] }
 0x25e   :  { %1536 = vmatpush3.msra.mxu1 %v1813_v63  ;;  %1479 = vmatprep.mubr.f32.mxu1 %v808_v39  ;;  %v1019_v43 = vld [vmem:[#allocation3 + $0x1a] sm:$0xff]  ;;  %v1029_v63 = vld [vmem:[#allocation9 + $0x138] sm:$0xff] }
 0x25f   :  { %1521 = vmatprep.subr.mxu1 %v1036_v32  ;;  %1490 = vmatprep.subr.mxu0 %v1033_v37  ;;  %v1020_v54 = vld [vmem:[#allocation3 + $0x22] sm:$0xff] }
 0x260   :  { %1537 = vmatpush3.msra.mxu1 %v1036_v32  ;;  %1491 = vmatpush3.msra.mxu0 %v1033_v37 }
 0x261   :  { %1522 = vmatprep.subr.mxu1 %v1035_v7  ;;  %1480 = vmatmul.mubr.f32.gmra.mxu1 %v809_v40 }
 0x262   :  { %1538 = vmatpush3.msra.mxu1 %v1035_v7  ;;  %1517 = vmatprep.mubr.f32.mxu1 %v1019_v43 }
 0x263   :  { %1523 = vmatprep.subr.mxu1 %v1034_v33  ;;  %1492 = vmatprep.subr.mxu0 %v1032_v42 }
 0x264   :  { %1539 = vmatpush3.msra.mxu1 %v1034_v33  ;;  %1493 = vmatpush3.msra.mxu0 %v1032_v42 }
 0x265   :  { %1524 = vmatprep.subr.mxu1 %v1033_v37  ;;  %1494 = vmatprep.subr.mxu0 %v1031_v44 }
 0x266   :  { %1540 = vmatpush3.msra.mxu1 %v1033_v37  ;;  %1495 = vmatpush3.msra.mxu0 %v1031_v44 }
 0x267   :  { %1525 = vmatprep.subr.mxu1 %v1032_v42  ;;  %1496 = vmatprep.subr.mxu0 %v1030_v45 }
 0x268   :  { %1541 = vmatpush3.msra.mxu1 %v1032_v42  ;;  %1497 = vmatpush3.msra.mxu0 %v1030_v45  ;;  %v1212_v42 = vld [vmem:[%s1845_s8] ss:$0 sm:$0xff]  ;;  %s1626_s8 = scalar_lea.vmem %s1197_s7, 512 }
 0x269   :  { %1526 = vmatprep.subr.mxu1 %v1031_v44  ;;  %1498 = vmatprep.subr.mxu0 %v1029_v63  ;;  %p1627_p1 = scmp.ne.s32.totalorder %s1197_s7, %s1626_s8  ;;  %p1632_p3 = scmp.lt.s32.totalorder %s1626_s8, %s1626_s8 }
 0x26a   :  { %1542 = vmatpush3.msra.mxu1 %v1031_v44  ;;  %1499 = vmatpush3.msra.mxu0 %v1029_v63 }
 0x26b   :  { %1527 = vmatprep.subr.mxu1 %v1030_v45  ;;  %1500 = vmatprep.subr.mxu0 %v1028_v46  ;;  %p1633_p4 = por %p1632_p3, %p1631_p2 }
 0x26c   :  { %1543 = vmatpush3.msra.mxu1 %v1030_v45  ;;  %1501 = vmatpush3.msra.mxu0 %v1028_v46 }
 0x26d   :  { %1528 = vmatprep.subr.mxu1 %v1029_v63  ;;  %1502 = vmatprep.subr.mxu0 %v1027_v47  ;;  %p1634_p5 = pnand %p1633_p4, %p1627_p1 }
 0x26e   :  { %1544 = vmatpush3.msra.mxu1 %v1029_v63  ;;  %1503 = vmatpush3.msra.mxu0 %v1027_v47 }
 0x26f   :  { %1529 = vmatprep.subr.mxu1 %v1028_v46  ;;  %1504 = vmatprep.subr.mxu0 %v1026_v48 }
 0x270   :  { %1545 = vmatpush3.msra.mxu1 %v1028_v46  ;;  %1505 = vmatpush3.msra.mxu0 %v1026_v48  ;;  %v1213_v46 = vld [vmem:[%s1846_s9] ss:$0 sm:$0xff] }
 0x271   :  { %1530 = vmatprep.subr.mxu1 %v1027_v47  ;;  %1506 = vmatprep.subr.mxu0 %v1025_v49 }
 0x272   :  { %1546 = vmatpush3.msra.mxu1 %v1027_v47  ;;  %1507 = vmatpush3.msra.mxu0 %v1025_v49 }
 0x273   :  { %1531 = vmatprep.subr.mxu1 %v1026_v48  ;;  %1508 = vmatprep.subr.mxu0 %v1024_v50 }
 0x274   :  { %1547 = vmatpush3.msra.mxu1 %v1026_v48  ;;  %1509 = vmatpush3.msra.mxu0 %v1024_v50 }
 0x275   :  { %1532 = vmatprep.subr.mxu1 %v1025_v49  ;;  %1510 = vmatprep.subr.mxu0 %v1023_v51 }
 0x276   :  { %1548 = vmatpush3.msra.mxu1 %v1025_v49  ;;  %1511 = vmatpush3.msra.mxu0 %v1023_v51 }
 0x277   :  { %1533 = vmatprep.subr.mxu1 %v1024_v50  ;;  %1512 = vmatprep.subr.mxu0 %v1022_v52 }
 0x278   :  { %1549 = vmatpush3.msra.mxu1 %v1024_v50  ;;  %1513 = vmatpush3.msra.mxu0 %v1022_v52 }
 0x279   :  { %1534 = vmatprep.subr.mxu1 %v1023_v51  ;;  %1515 = vmatmul.mubr.f32.vlgmr.msra.gmra.mxu0 %v1018_v53 }
 0x27a   :  { %1550 = vmatpush3.msra.mxu1 %v1023_v51 }
 0x27b   :  { %1535 = vmatprep.subr.mxu1 %v1022_v52 }
 0x27c   :  { %1551 = vmatpush3.msra.mxu1 %v1022_v52 }
 0x27d   :  { %1518 = vmatmul.mubr.f32.vlgmr.msra.gmra.mxu1 %v1020_v54 }
 0x315   :  { %v1440_v55 = vpop.f32.mrf.mxu0 }
 0x317   :  { %v913_v56 = vpop.f32.mrf.mxu0 }
 0x319   :  { %v1443_v58 = vpop.f32.mrf.mxu0 }
 0x31b   :  { %v923_v60 = vpop.f32.mrf.mxu0 }
 0x31d   :  { %v1478_v38 = vpop.f32.mrf.mxu1 }
 0x31e   :  { %v1004_v2 = vadd.f32 %v1478_v38, %v1440_v55 }
 0x31f   :  { %v998_v57 = vpop.f32.mrf.mxu1 }
 0x320   :  { %v999_v62 = vadd.f32 %v998_v57, %v913_v56 }
 0x321   :  { %v1481_v59 = vpop.f32.mrf.mxu1 }
 0x322   :  { %v1014_v9 = vadd.f32 %v1481_v59, %v1443_v58 }
 0x323   :  { %v1008_v0 = vpop.f32.mrf.mxu1 }
 0x324   :  { %v1009_v5 = vadd.f32 %v1008_v0, %v923_v60 }
 0x339   :  { %v1516_v61 = vpop.f32.mrf.mxu0 }
 0x33a   :  { %v1124_v6 = vadd.f32 %v1516_v61, %v1004_v2 }
 0x33b   :  { %v1104_v1 = vpop.f32.mrf.mxu0 }
 0x33c   :  { %v1123_v3 = vadd.f32 %v1104_v1, %v999_v62 }
 0x33d   :  { %v1519_v4 = vpop.f32.mrf.mxu1 }
 0x33e   :  { %v1129_v10 = vadd.f32 %v1124_v6, %v1123_v3  ;;  %v1126_v12 = vadd.f32 %v1519_v4, %v1014_v9 }
 0x33f   :  { %v1114_v8 = vpop.f32.mrf.mxu1 }
 0x340   :  { %v1125_v11 = vadd.f32 %v1114_v8, %v1009_v5 }
 0x342   :  { %v1130_v13 = vadd.f32 %v1129_v10, %v1125_v11 }
 0x344   :  { %v1131_v14 = vadd.f32 %v1130_v13, %v1126_v12 }
 0x346   :  { %v1132_v15 = vrot.slane %v1131_v14, 4 }
 0x348   :  { %v1133_v16 = vadd.f32 %v1132_v15, %v1131_v14 }
 0x34a   :  { %v1134_v17 = vrot.slane %v1133_v16, 2 }
 0x34c   :  { %v1135_v18 = vadd.f32 %v1134_v17, %v1133_v16 }
 0x34e   :  { %v1136_v20 = vrot.slane %v1135_v18, 1 }
 0x350   :  { %v1137_v21 = vadd.f32 %v1136_v20, %v1135_v18 }
 0x352   :  { %v1138_v36 = vmul.f32 0.03125, %v1137_v21 }
 0x354   :  { %v1139_v22 = vsub.f32 %v1123_v3, %v1138_v36  ;;  %v1140_v23 = vsub.f32 %v1124_v6, %v1138_v36  ;;  %v1141_v24 = vsub.f32 %v1125_v11, %v1138_v36  ;;  %v1142_v25 = vsub.f32 %v1126_v12, %v1138_v36 }
 0x356   :  { %v1143_v26 = vmul.f32 %v1139_v22, %v1139_v22  ;;  %v1144_v27 = vmul.f32 %v1140_v23, %v1140_v23  ;;  %v1145_v28 = vmul.f32 %v1141_v24, %v1141_v24  ;;  %v1146_v29 = vmul.f32 %v1142_v25, %v1142_v25 }
 0x358   :  { %v1147_v19 = vadd.f32 %v1144_v27, %v1143_v26 }
 0x35a   :  { %v1148_v30 = vadd.f32 %v1147_v19, %v1145_v28 }
 0x35c   :  { %v1149_v31 = vadd.f32 %v1148_v30, %v1146_v29 }
 0x35e   :  { %v1150_v32 = vrot.slane %v1149_v31, 4 }
 0x360   :  { %v1151_v7 = vadd.f32 %v1150_v32, %v1149_v31 }
 0x362   :  { %v1152_v33 = vrot.slane %v1151_v7, 2 }
 0x364   :  { %v1153_v41 = vadd.f32 %v1152_v33, %v1151_v7 }
 0x366   :  { %v1154_v34 = vrot.slane %v1153_v41, 1 }
 0x368   :  { %v1155_v35 = vadd.f32 %v1154_v34, %v1153_v41 }
 0x36a   :  { %v1156_v37 = vmul.f32 0.03125, %v1155_v35 }
 0x36c   :  { %v1157_v39 = vadd.f32 1e-05, %v1156_v37 }
 0x36e   :  { %1564 = vrsqrt.f32 %v1157_v39 }
 0x37b   :  { %v1565_v40 = vpop.eup %1564 }
 0x37c   :  { %v1159_v43 = vmul.f32 %v1565_v40, %v1139_v22  ;;  %v1160_v44 = vmul.f32 %v1565_v40, %v1140_v23  ;;  %v1161_v45 = vmul.f32 %v1565_v40, %v1141_v24  ;;  %v1162_v63 = vmul.f32 %v1565_v40, %v1142_v25 }
 0x37e   :  { %v1171_v47 = vmul.f32 %v1212_v42, %v1161_v45  ;;  %v1169_v48 = vmul.f32 %v1212_v42, %v1159_v43  ;;  %v1170_v49 = vmul.f32 %v1212_v42, %v1160_v44  ;;  %v1172_v50 = vmul.f32 %v1212_v42, %v1162_v63 }
 0x380   :  { %v1181_v51 = vadd.f32 %v1213_v46, %v1171_v47  ;;  %v1179_v52 = vadd.f32 %v1213_v46, %v1169_v48  ;;  %v1180_v53 = vadd.f32 %v1213_v46, %v1170_v49  ;;  %v1182_v54 = vadd.f32 %v1213_v46, %v1172_v50 }
 0x382   :  { %v1185_v55 = vmax.f32 %v1181_v51, 0.0  ;;  %v1183_v38 = vmax.f32 %v1179_v52, 0.0  ;;  %v1184_v56 = vmax.f32 %v1180_v53, 0.0  ;;  %v1186_v57 = vmax.f32 %v1182_v54, 0.0 }
 0x384   :  { %1189 = vst [vmem:[#allocation10 + $0x10] sm:$0xff] %v1185_v55  ;;  %1187 = vst [vmem:[#allocation10] sm:$0xff] %v1183_v38 }
 0x385   :  { %1188 = vst [vmem:[#allocation10 + $0x8] sm:$0xff] %v1184_v56  ;;  %1190 = vst [vmem:[#allocation10 + $0x18] sm:$0xff] %v1186_v57 }
 0x386   :  { %1637 = shalt.err (!%p1634_p5)
}
 0x387   :  { %1202 = dma.vmem_to_hbm [thread:$0]  %s1197_s7, 512, %s1847_s10, [#allocation6], %s1653_s16, %s1653_s16, %s1654_s17  }
 0x388   :  { %1650 = dma.done.wait [#allocation6], 512  }
 0x389   :  { %1651 = vsyncadd [#allocation6], 4294966784 }
 0x38a   :  { %1206 = vsyncpa [#allocation5], 1 }
 0x38b   :  { %1207 = vsyncpa [#allocation8], 1 }
 0x38c   :  { %1208 = vsyncpa [#allocation6], 1 }

</bundles_post_ra>
